<compile_context>
chip_gen: v7x
topology: tpu7x:2x2x1
jax: 0.10.0
libtpu: 0.0.40
codegen_flags: <defaults>
</compile_context>

<pallas_src>
import math
from functools import reduce
from math import gcd

import jax
import jax.numpy as jnp
from jax import lax
from jax.experimental import pallas as pl
from jax.experimental.pallas import tpu as pltpu

# ---------------- configuration -------------------------------------------------
NUM_TOKENS = 64
DIM = 32
MAX_BLOCK_SIZE = 4
DS = 4                                              # downsample_factor
BLOCKS = tuple((s, 0) for s in range(1, MAX_BLOCK_SIZE + 1))
NB = len(BLOCKS)
B = 2
N = 8                                               # input sequence length


def _lcm(*nums):
    return int(reduce(lambda x, y: int(x * y / gcd(x, y)), nums, 1))


BLOCK_MULT = _lcm(*[s for s, _ in BLOCKS])          # 12
L = math.ceil(N / BLOCK_MULT) * BLOCK_MULT          # seq padded to block multiple (12)
M = math.ceil(N / DS) * DS                          # seq padded to downsample factor (8)
K = MAX_BLOCK_SIZE                                  # conv kernel size
BN = B * N                                          # batch-folded conv rows (16)
BL = B * L                                          # batch-folded block rows (24)
OUT_ROWS = B * (M // DS)                            # 4
OUT_LANES = OUT_ROWS * DIM                          # 128  -> lane-dense output store


# ---------------- in-kernel integer index helpers (no vector int div/rem) --------
def _floordiv(idx, size, upper):
    """Elementwise idx // size for int32 idx in [0, upper), built only from static
    threshold compares + adds (avoids vector integer division in Mosaic)."""
    if size == 1:
        return idx
    out = jnp.zeros_like(idx)
    one = jnp.ones_like(idx)
    t = size
    while t < upper:
        out = out + jnp.where(idx >= t, one, jnp.zeros_like(idx))
        t += size
    return out


def _split(idx, inner, upper):
    """Decompose idx in [0, upper) into (idx // inner, idx % inner)."""
    hi = _floordiv(idx, inner, upper)
    return hi, idx - hi * inner


def _softmax_last(x):
    mx = jnp.max(x, axis=-1, keepdims=True)
    e = jnp.exp(x - mx)
    # EUP approximate reciprocal for the denominator (perf-review suggestion).
    return e * pl.reciprocal(jnp.sum(e, axis=-1, keepdims=True), approx=True)


# ---------------- the fused GBST kernel ------------------------------------------
def _gbst_kernel(tok_ref, emb_ref, wdw_ref, bdw_ref, wproj_ref, bproj_ref,
                 wscore_ref, bscore_ref, o_ref):
    f32 = jnp.float32

    # -- 1. embedding gather fused in-kernel: one-hot @ table on the MXU ----------
    vocab = lax.broadcasted_iota(jnp.int32, (BN, NUM_TOKENS), 1)
    onehot = jnp.where(vocab == tok_ref[...], 1.0, 0.0)                    # (BN, V)
    x = jnp.dot(onehot, emb_ref[...], preferred_element_type=f32)          # (BN, DIM)

    # -- 2. depthwise conv (right zero-pad K-1) via a stacked shift matrix --------
    # rows of `shift` are (k, b*N+n); cols are (b'*N+n'); 1 iff col == row_pos + k
    # and same batch (which also encodes the zero padding beyond position N-1).
    r = lax.broadcasted_iota(jnp.int32, (K * BN, BN), 0)
    c = lax.broadcasted_iota(jnp.int32, (K * BN, BN), 1)
    k_id, i_id = _split(r, BN, K * BN)
    i_b = _floordiv(i_id, N, BN)
    c_b = _floordiv(c, N, BN)
    shift = jnp.where((c == i_id + k_id) & (i_b == c_b), 1.0, 0.0)         # (K*BN, BN)
    xs = jnp.dot(shift, x, preferred_element_type=f32)                     # (K*BN, DIM)

    acc = xs[0:BN, :] * wdw_ref[0:1, :]                                    # tap k=0
    for k in range(1, K):                                                  # aligned slices
        acc = acc + xs[k * BN:(k + 1) * BN, :] * wdw_ref[k:k + 1, :]
    acc = acc + bdw_ref[...]
    y = jnp.dot(acc, wproj_ref[...], preferred_element_type=f32) + bproj_ref[...]  # (BN, DIM)

    # -- 3. block-mean representations: all block sizes + whole batch, one matmul --
    # mix_mats[s] maps (b, n) -> (b, l) block means (implicitly includes the
    # pad-to-block-multiple: padded positions contribute zero, divisor stays s).
    rr = lax.broadcasted_iota(jnp.int32, (BL, BN), 0)
    cc = lax.broadcasted_iota(jnp.int32, (BL, BN), 1)
    b_r, l_r = _split(rr, L, BL)
    b_c, n_c = _split(cc, N, BN)
    same_batch = b_r == b_c
    mix_mats = []
    for s, _ in BLOCKS:
        same_block = _floordiv(l_r, s, L) == _floordiv(n_c, s, N)
        mix_mats.append(jnp.where(same_batch & same_block, 1.0 / s, 0.0))  # (BL, BN)
    a_all = jnp.concatenate(mix_mats, axis=0)                              # (NB*BL, BN)
    brs = jnp.dot(a_all, y, preferred_element_type=f32)                    # (NB*BL, DIM)

    # -- 4. score_fn (Linear(dim, 1)): one stacked matmul, regroup to (BL, NB) ----
    sc = jnp.dot(brs, wscore_ref[...], preferred_element_type=f32)         # (NB*BL, 1)
    scores = jnp.concatenate([sc[bi * BL:(bi + 1) * BL, :] for bi in range(NB)],
                             axis=1) + bscore_ref[...]                     # (BL, NB)
    scores = _softmax_last(scores)                                         # softmax over NB

    # -- 5. score-consensus attention; batches kept separate via a -inf mask ------
    sim = lax.dot_general(scores, scores, (((1,), (1,)), ((), ())),
                          preferred_element_type=f32)                      # (BL, BL)
    ri = lax.broadcasted_iota(jnp.int32, (BL, BL), 0)
    ci = lax.broadcasted_iota(jnp.int32, (BL, BL), 1)
    sim = jnp.where(_floordiv(ri, L, BL) == _floordiv(ci, L, BL), sim, -1e30)
    scores = jnp.dot(_softmax_last(sim), scores, preferred_element_type=f32)  # (BL, NB)

    # -- 6. weighted sum + crop-to-M + downsample mean, fused into the matmul chain
    wmix = mix_mats[0] * scores[:, 0:1]
    for bi in range(1, NB):
        wmix = wmix + mix_mats[bi] * scores[:, bi:bi + 1]                  # (BL, BN)
    mixed = jnp.dot(wmix, y, preferred_element_type=f32)                   # (BL, DIM)

    rp = lax.broadcasted_iota(jnp.int32, (OUT_ROWS, BL), 0)
    cp = lax.broadcasted_iota(jnp.int32, (OUT_ROWS, BL), 1)
    pb, pi = _split(rp, M // DS, OUT_ROWS)
    cb, cl = _split(cp, L, BL)
    pool = jnp.where((pb == cb) & (_floordiv(cl, DS, L) == pi), 1.0 / DS, 0.0)
    out = jnp.dot(pool, mixed, preferred_element_type=f32)                 # (OUT_ROWS, DIM)

    # -- 7. lane-dense store: (OUT_ROWS, DIM) -> (1, OUT_ROWS*DIM) = (1, 128) ------
    o_ref[...] = jnp.concatenate([out[i:i + 1, :] for i in range(OUT_ROWS)], axis=1)


# ---------------- wrapper --------------------------------------------------------
def _full_spec(shape):
    return pl.BlockSpec(shape, lambda i, _s=len(shape): (0,) * _s)


def gbst_forward(tokens, p):
    tok2d = tokens.reshape(BN, 1).astype(jnp.int32)        # tiny int reshape only
    out_flat = pl.pallas_call(
        _gbst_kernel,
        out_shape=jax.ShapeDtypeStruct((1, OUT_LANES), jnp.float32),
        grid=(1,),                                          # single fused grid step
        in_specs=[
            _full_spec((BN, 1)),
            _full_spec((NUM_TOKENS, DIM)),
            _full_spec((K, DIM)),
            _full_spec((1, DIM)),
            _full_spec((DIM, DIM)),
            _full_spec((1, DIM)),
            _full_spec((DIM, 1)),
            _full_spec((1, 1)),
        ],
        out_specs=_full_spec((1, OUT_LANES)),
        compiler_params=pltpu.CompilerParams(dimension_semantics=("arbitrary",)),
    )(tok2d, p["token_emb"], p["w_dw"], p["b_dw"], p["w_proj"], p["b_proj"],
      p["w_score"], p["b_score"])
    return out_flat.reshape(B, M // DS, DIM)


# ---------------- parameters -----------------------------------------------------
def init_params(key):
    ks = jax.random.split(key, 6)
    return {
        # nn.Embedding(num_tokens, dim)
        "token_emb": jax.random.normal(ks[0], (NUM_TOKENS, DIM), jnp.float32) * 0.02,
        # nn.Conv1d(dim, dim, K, groups=dim): weight stored as (K, dim)
        "w_dw": jax.random.normal(ks[1], (K, DIM), jnp.float32) * 0.1,
        "b_dw": jax.random.normal(ks[2], (1, DIM), jnp.float32) * 0.1,
        # nn.Conv1d(dim, dim, 1): weight stored as (dim_in, dim_out)
        "w_proj": jax.random.normal(ks[3], (DIM, DIM), jnp.float32) * 0.1,
        "b_proj": jax.random.normal(ks[4], (1, DIM), jnp.float32) * 0.1,
        # nn.Linear(dim, 1): weight stored as (dim, 1)
        "w_score": jax.random.normal(ks[5], (DIM, 1), jnp.float32) * 0.1,
        "b_score": jnp.zeros((1, 1), jnp.float32),
    }


# ---------------- pure-JAX reference (mirrors the PyTorch forward) ----------------
def reference_forward(tokens, p):
    x_emb = p["token_emb"][tokens]
    xp = jnp.pad(x_emb, ((0, 0), (0, K - 1), (0, 0)))
    y = jnp.zeros((B, N, DIM), jnp.float32)
    for k in range(K):
        y = y + xp[:, k:k + N, :] * p["w_dw"][k][None, None, :]
    y = y + p["b_dw"]
    y = jnp.einsum("bnd,de->bne", y, p["w_proj"]) + p["b_proj"]
    xL = jnp.pad(y, ((0, 0), (0, L - N), (0, 0)))
    brs = []
    for s, _ in BLOCKS:
        blk = xL.reshape(B, L // s, s, DIM).mean(axis=2)
        brs.append(jnp.repeat(blk, s, axis=1))
    block_reprs = jnp.stack(brs, axis=2)                                # (B, L, NB, DIM)
    scores = jnp.einsum("blnd,d->bln", block_reprs, p["w_score"][:, 0]) + p["b_score"][0, 0]
    scores = jax.nn.softmax(scores, axis=2)
    sim = jnp.einsum("bid,bjd->bij", scores, scores)
    attn = jax.nn.softmax(sim, axis=-1)
    scores = jnp.einsum("bij,bjm->bim", attn, scores)
    x = (block_reprs * scores[..., None]).sum(axis=2)
    x = x[:, :M].reshape(B, M // DS, DS, DIM).mean(axis=2)
    return x


if __name__ == "__main__":
    key = jax.random.PRNGKey(0)
    pkey, tkey = jax.random.split(key)
    params = init_params(pkey)
    tokens = jax.random.randint(tkey, (B, N), 0, NUM_TOKENS)

    out = gbst_forward(tokens, params)
    out = jax.block_until_ready(out)
    assert out.shape == (B, M // DS, DIM)

    ref = reference_forward(tokens, params)
    err = float(jnp.max(jnp.abs(out - ref)))
    # With exact division the kernel matches to ~1e-5; the bound leaves headroom for
    # the EUP approximate reciprocal (pl.reciprocal(approx=True)) in both softmaxes.
    assert err < 5e-3, f"max abs err {err}"
    # TODO(synk): mask / causal / no_conv / lang_embs branches of GBST are not exercised
    # here (module defaults only); at production L also add a leading parallel batch
    # grid axis (v7x 2-TC split) and bf16 MXU operands.
    print("KERNEL_OK")
</pallas_src>

<mosaic_0001>
module attributes {stable_mosaic.version = 11 : i64} {
  func.func @_gbst_kernel(%arg0: i32, %arg1: memref<16x1xi32, #tpu.memory_space<vmem>>, %arg2: memref<64x32xf32, #tpu.memory_space<vmem>>, %arg3: memref<4x32xf32, #tpu.memory_space<vmem>>, %arg4: memref<1x32xf32, #tpu.memory_space<vmem>>, %arg5: memref<32x32xf32, #tpu.memory_space<vmem>>, %arg6: memref<1x32xf32, #tpu.memory_space<vmem>>, %arg7: memref<32x1xf32, #tpu.memory_space<vmem>>, %arg8: memref<1x1xf32, #tpu.memory_space<vmem>>, %arg9: memref<1x128xf32, #tpu.memory_space<vmem>>) attributes {dimension_semantics = [#tpu.dimension_semantics<arbitrary>], iteration_bounds = array<i64: 1>, scalar_prefetch = 0 : i64, scratch_operands = 0 : i64, tpu.core_type = #tpu.core_type<tc>, window_params = [{pipeline_mode = #tpu.pipeline_mode<synchronous>, transform_indices = @transform_0, window_bounds = array<i64: 16, 1>}, {pipeline_mode = #tpu.pipeline_mode<synchronous>, transform_indices = @transform_1, window_bounds = array<i64: 64, 32>}, {pipeline_mode = #tpu.pipeline_mode<synchronous>, transform_indices = @transform_2, window_bounds = array<i64: 4, 32>}, {pipeline_mode = #tpu.pipeline_mode<synchronous>, transform_indices = @transform_3, window_bounds = array<i64: 1, 32>}, {pipeline_mode = #tpu.pipeline_mode<synchronous>, transform_indices = @transform_4, window_bounds = array<i64: 32, 32>}, {pipeline_mode = #tpu.pipeline_mode<synchronous>, transform_indices = @transform_5, window_bounds = array<i64: 1, 32>}, {pipeline_mode = #tpu.pipeline_mode<synchronous>, transform_indices = @transform_6, window_bounds = array<i64: 32, 1>}, {pipeline_mode = #tpu.pipeline_mode<synchronous>, transform_indices = @transform_7, window_bounds = array<i64: 1, 1>}, {pipeline_mode = #tpu.pipeline_mode<synchronous>, transform_indices = @transform_8, window_bounds = array<i64: 1, 128>}]} {
    %0 = tpu.iota {dimensions = array<i32: 1>} : vector<16x64xi32>
    %c0 = arith.constant 0 : index
    %c0_0 = arith.constant 0 : index
    %1 = vector.load %arg1[%c0, %c0_0] : memref<16x1xi32, #tpu.memory_space<vmem>>, vector<16x1xi32>
    %2 = vector.broadcast %1 : vector<16x1xi32> to vector<16x64xi32>
    %3 = arith.cmpi eq, %0, %2 : vector<16x64xi32>
    %cst = arith.constant 1.000000e+00 : f32
    %cst_1 = arith.constant 0.000000e+00 : f32
    %4 = vector.broadcast %cst : f32 to vector<16x64xf32>
    %5 = vector.broadcast %cst_1 : f32 to vector<16x64xf32>
    %6 = arith.select %3, %4, %5 : vector<16x64xi1>, vector<16x64xf32>
    %c0_2 = arith.constant 0 : index
    %c0_3 = arith.constant 0 : index
    %7 = vector.load %arg2[%c0_2, %c0_3] : memref<64x32xf32, #tpu.memory_space<vmem>>, vector<64x32xf32>
    %cst_4 = arith.constant dense<0.000000e+00> : vector<16x32xf32>
    %8 = tpu.matmul %6, %7, %cst_4 {dimension_numbers = #tpu.dot_dimension_numbers<[1], [0], [0], [1], [0, 0, 1, 1], [], []>} : vector<16x64xf32>, vector<64x32xf32>, vector<16x32xf32> -> vector<16x32xf32>
    %9 = tpu.iota {dimensions = array<i32: 0>} : vector<64x16xi32>
    %10 = tpu.iota {dimensions = array<i32: 1>} : vector<64x16xi32>
    %c0_i32 = arith.constant 0 : i32
    %11 = vector.broadcast %c0_i32 : i32 to vector<64x16xi32>
    %c1_i32 = arith.constant 1 : i32
    %12 = vector.broadcast %c1_i32 : i32 to vector<64x16xi32>
    %c16_i32 = arith.constant 16 : i32
    %13 = vector.broadcast %c16_i32 : i32 to vector<64x16xi32>
    %14 = arith.cmpi sge, %9, %13 : vector<64x16xi32>
    %c0_i32_5 = arith.constant 0 : i32
    %15 = vector.broadcast %c0_i32_5 : i32 to vector<64x16xi32>
    %16 = arith.select %14, %12, %15 : vector<64x16xi1>, vector<64x16xi32>
    %17 = arith.addi %11, %16 : vector<64x16xi32>
    %c32_i32 = arith.constant 32 : i32
    %18 = vector.broadcast %c32_i32 : i32 to vector<64x16xi32>
    %19 = arith.cmpi sge, %9, %18 : vector<64x16xi32>
    %c0_i32_6 = arith.constant 0 : i32
    %20 = vector.broadcast %c0_i32_6 : i32 to vector<64x16xi32>
    %21 = arith.select %19, %12, %20 : vector<64x16xi1>, vector<64x16xi32>
    %22 = arith.addi %17, %21 : vector<64x16xi32>
    %c48_i32 = arith.constant 48 : i32
    %23 = vector.broadcast %c48_i32 : i32 to vector<64x16xi32>
    %24 = arith.cmpi sge, %9, %23 : vector<64x16xi32>
    %c0_i32_7 = arith.constant 0 : i32
    %25 = vector.broadcast %c0_i32_7 : i32 to vector<64x16xi32>
    %26 = arith.select %24, %12, %25 : vector<64x16xi1>, vector<64x16xi32>
    %27 = arith.addi %22, %26 : vector<64x16xi32>
    %c16_i32_8 = arith.constant 16 : i32
    %28 = vector.broadcast %c16_i32_8 : i32 to vector<64x16xi32>
    %29 = arith.muli %27, %28 : vector<64x16xi32>
    %30 = arith.subi %9, %29 : vector<64x16xi32>
    %c0_i32_9 = arith.constant 0 : i32
    %31 = vector.broadcast %c0_i32_9 : i32 to vector<64x16xi32>
    %c1_i32_10 = arith.constant 1 : i32
    %32 = vector.broadcast %c1_i32_10 : i32 to vector<64x16xi32>
    %c8_i32 = arith.constant 8 : i32
    %33 = vector.broadcast %c8_i32 : i32 to vector<64x16xi32>
    %34 = arith.cmpi sge, %30, %33 : vector<64x16xi32>
    %c0_i32_11 = arith.constant 0 : i32
    %35 = vector.broadcast %c0_i32_11 : i32 to vector<64x16xi32>
    %36 = arith.select %34, %32, %35 : vector<64x16xi1>, vector<64x16xi32>
    %37 = arith.addi %31, %36 : vector<64x16xi32>
    %c0_i32_12 = arith.constant 0 : i32
    %38 = vector.broadcast %c0_i32_12 : i32 to vector<64x16xi32>
    %c1_i32_13 = arith.constant 1 : i32
    %39 = vector.broadcast %c1_i32_13 : i32 to vector<64x16xi32>
    %c8_i32_14 = arith.constant 8 : i32
    %40 = vector.broadcast %c8_i32_14 : i32 to vector<64x16xi32>
    %41 = arith.cmpi sge, %10, %40 : vector<64x16xi32>
    %c0_i32_15 = arith.constant 0 : i32
    %42 = vector.broadcast %c0_i32_15 : i32 to vector<64x16xi32>
    %43 = arith.select %41, %39, %42 : vector<64x16xi1>, vector<64x16xi32>
    %44 = arith.addi %38, %43 : vector<64x16xi32>
    %45 = arith.addi %30, %27 : vector<64x16xi32>
    %46 = arith.cmpi eq, %10, %45 : vector<64x16xi32>
    %47 = arith.cmpi eq, %37, %44 : vector<64x16xi32>
    %48 = arith.andi %46, %47 : vector<64x16xi1>
    %cst_16 = arith.constant 1.000000e+00 : f32
    %cst_17 = arith.constant 0.000000e+00 : f32
    %49 = vector.broadcast %cst_16 : f32 to vector<64x16xf32>
    %50 = vector.broadcast %cst_17 : f32 to vector<64x16xf32>
    %51 = arith.select %48, %49, %50 : vector<64x16xi1>, vector<64x16xf32>
    %cst_18 = arith.constant dense<0.000000e+00> : vector<64x32xf32>
    %52 = tpu.matmul %51, %8, %cst_18 {dimension_numbers = #tpu.dot_dimension_numbers<[1], [0], [0], [1], [0, 0, 1, 1], [], []>} : vector<64x16xf32>, vector<16x32xf32>, vector<64x32xf32> -> vector<64x32xf32>
    %53 = vector.extract_strided_slice %52 {offsets = [0, 0], sizes = [16, 32], strides = [1, 1]} : vector<64x32xf32> to vector<16x32xf32>
    %c0_19 = arith.constant 0 : index
    %c0_20 = arith.constant 0 : index
    %54 = vector.load %arg3[%c0_19, %c0_20] : memref<4x32xf32, #tpu.memory_space<vmem>>, vector<1x32xf32>
    %55 = vector.broadcast %54 : vector<1x32xf32> to vector<16x32xf32>
    %56 = arith.mulf %53, %55 : vector<16x32xf32>
    %57 = vector.extract_strided_slice %52 {offsets = [16, 0], sizes = [16, 32], strides = [1, 1]} : vector<64x32xf32> to vector<16x32xf32>
    %c1 = arith.constant 1 : index
    %c0_21 = arith.constant 0 : index
    %58 = vector.load %arg3[%c1, %c0_21] : memref<4x32xf32, #tpu.memory_space<vmem>>, vector<1x32xf32>
    %59 = vector.broadcast %58 : vector<1x32xf32> to vector<16x32xf32>
    %60 = arith.mulf %57, %59 : vector<16x32xf32>
    %61 = arith.addf %56, %60 : vector<16x32xf32>
    %62 = vector.extract_strided_slice %52 {offsets = [32, 0], sizes = [16, 32], strides = [1, 1]} : vector<64x32xf32> to vector<16x32xf32>
    %c2 = arith.constant 2 : index
    %c0_22 = arith.constant 0 : index
    %63 = vector.load %arg3[%c2, %c0_22] : memref<4x32xf32, #tpu.memory_space<vmem>>, vector<1x32xf32>
    %64 = vector.broadcast %63 : vector<1x32xf32> to vector<16x32xf32>
    %65 = arith.mulf %62, %64 : vector<16x32xf32>
    %66 = arith.addf %61, %65 : vector<16x32xf32>
    %67 = vector.extract_strided_slice %52 {offsets = [48, 0], sizes = [16, 32], strides = [1, 1]} : vector<64x32xf32> to vector<16x32xf32>
    %c3 = arith.constant 3 : index
    %c0_23 = arith.constant 0 : index
    %68 = vector.load %arg3[%c3, %c0_23] : memref<4x32xf32, #tpu.memory_space<vmem>>, vector<1x32xf32>
    %69 = vector.broadcast %68 : vector<1x32xf32> to vector<16x32xf32>
    %70 = arith.mulf %67, %69 : vector<16x32xf32>
    %71 = arith.addf %66, %70 : vector<16x32xf32>
    %c0_24 = arith.constant 0 : index
    %c0_25 = arith.constant 0 : index
    %72 = vector.load %arg4[%c0_24, %c0_25] : memref<1x32xf32, #tpu.memory_space<vmem>>, vector<1x32xf32>
    %73 = vector.broadcast %72 : vector<1x32xf32> to vector<16x32xf32>
    %74 = arith.addf %71, %73 : vector<16x32xf32>
    %c0_26 = arith.constant 0 : index
    %c0_27 = arith.constant 0 : index
    %75 = vector.load %arg5[%c0_26, %c0_27] : memref<32x32xf32, #tpu.memory_space<vmem>>, vector<32x32xf32>
    %cst_28 = arith.constant dense<0.000000e+00> : vector<16x32xf32>
    %76 = tpu.matmul %74, %75, %cst_28 {dimension_numbers = #tpu.dot_dimension_numbers<[1], [0], [0], [1], [0, 0, 1, 1], [], []>} : vector<16x32xf32>, vector<32x32xf32>, vector<16x32xf32> -> vector<16x32xf32>
    %c0_29 = arith.constant 0 : index
    %c0_30 = arith.constant 0 : index
    %77 = vector.load %arg6[%c0_29, %c0_30] : memref<1x32xf32, #tpu.memory_space<vmem>>, vector<1x32xf32>
    %78 = vector.broadcast %77 : vector<1x32xf32> to vector<16x32xf32>
    %79 = arith.addf %76, %78 : vector<16x32xf32>
    %80 = tpu.iota {dimensions = array<i32: 0>} : vector<24x16xi32>
    %81 = tpu.iota {dimensions = array<i32: 1>} : vector<24x16xi32>
    %c0_i32_31 = arith.constant 0 : i32
    %82 = vector.broadcast %c0_i32_31 : i32 to vector<24x16xi32>
    %c1_i32_32 = arith.constant 1 : i32
    %83 = vector.broadcast %c1_i32_32 : i32 to vector<24x16xi32>
    %c12_i32 = arith.constant 12 : i32
    %84 = vector.broadcast %c12_i32 : i32 to vector<24x16xi32>
    %85 = arith.cmpi sge, %80, %84 : vector<24x16xi32>
    %c0_i32_33 = arith.constant 0 : i32
    %86 = vector.broadcast %c0_i32_33 : i32 to vector<24x16xi32>
    %87 = arith.select %85, %83, %86 : vector<24x16xi1>, vector<24x16xi32>
    %88 = arith.addi %82, %87 : vector<24x16xi32>
    %c12_i32_34 = arith.constant 12 : i32
    %89 = vector.broadcast %c12_i32_34 : i32 to vector<24x16xi32>
    %90 = arith.muli %88, %89 : vector<24x16xi32>
    %91 = arith.subi %80, %90 : vector<24x16xi32>
    %c0_i32_35 = arith.constant 0 : i32
    %92 = vector.broadcast %c0_i32_35 : i32 to vector<24x16xi32>
    %c1_i32_36 = arith.constant 1 : i32
    %93 = vector.broadcast %c1_i32_36 : i32 to vector<24x16xi32>
    %c8_i32_37 = arith.constant 8 : i32
    %94 = vector.broadcast %c8_i32_37 : i32 to vector<24x16xi32>
    %95 = arith.cmpi sge, %81, %94 : vector<24x16xi32>
    %c0_i32_38 = arith.constant 0 : i32
    %96 = vector.broadcast %c0_i32_38 : i32 to vector<24x16xi32>
    %97 = arith.select %95, %93, %96 : vector<24x16xi1>, vector<24x16xi32>
    %98 = arith.addi %92, %97 : vector<24x16xi32>
    %c8_i32_39 = arith.constant 8 : i32
    %99 = vector.broadcast %c8_i32_39 : i32 to vector<24x16xi32>
    %100 = arith.muli %98, %99 : vector<24x16xi32>
    %101 = arith.subi %81, %100 : vector<24x16xi32>
    %102 = arith.cmpi eq, %88, %98 : vector<24x16xi32>
    %103 = arith.cmpi eq, %91, %101 : vector<24x16xi32>
    %104 = arith.andi %102, %103 : vector<24x16xi1>
    %cst_40 = arith.constant 1.000000e+00 : f32
    %cst_41 = arith.constant 0.000000e+00 : f32
    %105 = vector.broadcast %cst_40 : f32 to vector<24x16xf32>
    %106 = vector.broadcast %cst_41 : f32 to vector<24x16xf32>
    %107 = arith.select %104, %105, %106 : vector<24x16xi1>, vector<24x16xf32>
    %c0_i32_42 = arith.constant 0 : i32
    %108 = vector.broadcast %c0_i32_42 : i32 to vector<24x16xi32>
    %c1_i32_43 = arith.constant 1 : i32
    %109 = vector.broadcast %c1_i32_43 : i32 to vector<24x16xi32>
    %c2_i32 = arith.constant 2 : i32
    %110 = vector.broadcast %c2_i32 : i32 to vector<24x16xi32>
    %111 = arith.cmpi sge, %91, %110 : vector<24x16xi32>
    %c0_i32_44 = arith.constant 0 : i32
    %112 = vector.broadcast %c0_i32_44 : i32 to vector<24x16xi32>
    %113 = arith.select %111, %109, %112 : vector<24x16xi1>, vector<24x16xi32>
    %114 = arith.addi %108, %113 : vector<24x16xi32>
    %c4_i32 = arith.constant 4 : i32
    %115 = vector.broadcast %c4_i32 : i32 to vector<24x16xi32>
    %116 = arith.cmpi sge, %91, %115 : vector<24x16xi32>
    %c0_i32_45 = arith.constant 0 : i32
    %117 = vector.broadcast %c0_i32_45 : i32 to vector<24x16xi32>
    %118 = arith.select %116, %109, %117 : vector<24x16xi1>, vector<24x16xi32>
    %119 = arith.addi %114, %118 : vector<24x16xi32>
    %c6_i32 = arith.constant 6 : i32
    %120 = vector.broadcast %c6_i32 : i32 to vector<24x16xi32>
    %121 = arith.cmpi sge, %91, %120 : vector<24x16xi32>
    %c0_i32_46 = arith.constant 0 : i32
    %122 = vector.broadcast %c0_i32_46 : i32 to vector<24x16xi32>
    %123 = arith.select %121, %109, %122 : vector<24x16xi1>, vector<24x16xi32>
    %124 = arith.addi %119, %123 : vector<24x16xi32>
    %c8_i32_47 = arith.constant 8 : i32
    %125 = vector.broadcast %c8_i32_47 : i32 to vector<24x16xi32>
    %126 = arith.cmpi sge, %91, %125 : vector<24x16xi32>
    %c0_i32_48 = arith.constant 0 : i32
    %127 = vector.broadcast %c0_i32_48 : i32 to vector<24x16xi32>
    %128 = arith.select %126, %109, %127 : vector<24x16xi1>, vector<24x16xi32>
    %129 = arith.addi %124, %128 : vector<24x16xi32>
    %c10_i32 = arith.constant 10 : i32
    %130 = vector.broadcast %c10_i32 : i32 to vector<24x16xi32>
    %131 = arith.cmpi sge, %91, %130 : vector<24x16xi32>
    %c0_i32_49 = arith.constant 0 : i32
    %132 = vector.broadcast %c0_i32_49 : i32 to vector<24x16xi32>
    %133 = arith.select %131, %109, %132 : vector<24x16xi1>, vector<24x16xi32>
    %134 = arith.addi %129, %133 : vector<24x16xi32>
    %c0_i32_50 = arith.constant 0 : i32
    %135 = vector.broadcast %c0_i32_50 : i32 to vector<24x16xi32>
    %c1_i32_51 = arith.constant 1 : i32
    %136 = vector.broadcast %c1_i32_51 : i32 to vector<24x16xi32>
    %c2_i32_52 = arith.constant 2 : i32
    %137 = vector.broadcast %c2_i32_52 : i32 to vector<24x16xi32>
    %138 = arith.cmpi sge, %101, %137 : vector<24x16xi32>
    %c0_i32_53 = arith.constant 0 : i32
    %139 = vector.broadcast %c0_i32_53 : i32 to vector<24x16xi32>
    %140 = arith.select %138, %136, %139 : vector<24x16xi1>, vector<24x16xi32>
    %141 = arith.addi %135, %140 : vector<24x16xi32>
    %c4_i32_54 = arith.constant 4 : i32
    %142 = vector.broadcast %c4_i32_54 : i32 to vector<24x16xi32>
    %143 = arith.cmpi sge, %101, %142 : vector<24x16xi32>
    %c0_i32_55 = arith.constant 0 : i32
    %144 = vector.broadcast %c0_i32_55 : i32 to vector<24x16xi32>
    %145 = arith.select %143, %136, %144 : vector<24x16xi1>, vector<24x16xi32>
    %146 = arith.addi %141, %145 : vector<24x16xi32>
    %c6_i32_56 = arith.constant 6 : i32
    %147 = vector.broadcast %c6_i32_56 : i32 to vector<24x16xi32>
    %148 = arith.cmpi sge, %101, %147 : vector<24x16xi32>
    %c0_i32_57 = arith.constant 0 : i32
    %149 = vector.broadcast %c0_i32_57 : i32 to vector<24x16xi32>
    %150 = arith.select %148, %136, %149 : vector<24x16xi1>, vector<24x16xi32>
    %151 = arith.addi %146, %150 : vector<24x16xi32>
    %152 = arith.cmpi eq, %134, %151 : vector<24x16xi32>
    %153 = arith.andi %102, %152 : vector<24x16xi1>
    %cst_58 = arith.constant 5.000000e-01 : f32
    %cst_59 = arith.constant 0.000000e+00 : f32
    %154 = vector.broadcast %cst_58 : f32 to vector<24x16xf32>
    %155 = vector.broadcast %cst_59 : f32 to vector<24x16xf32>
    %156 = arith.select %153, %154, %155 : vector<24x16xi1>, vector<24x16xf32>
    %c0_i32_60 = arith.constant 0 : i32
    %157 = vector.broadcast %c0_i32_60 : i32 to vector<24x16xi32>
    %c1_i32_61 = arith.constant 1 : i32
    %158 = vector.broadcast %c1_i32_61 : i32 to vector<24x16xi32>
    %c3_i32 = arith.constant 3 : i32
    %159 = vector.broadcast %c3_i32 : i32 to vector<24x16xi32>
    %160 = arith.cmpi sge, %91, %159 : vector<24x16xi32>
    %c0_i32_62 = arith.constant 0 : i32
    %161 = vector.broadcast %c0_i32_62 : i32 to vector<24x16xi32>
    %162 = arith.select %160, %158, %161 : vector<24x16xi1>, vector<24x16xi32>
    %163 = arith.addi %157, %162 : vector<24x16xi32>
    %c6_i32_63 = arith.constant 6 : i32
    %164 = vector.broadcast %c6_i32_63 : i32 to vector<24x16xi32>
    %165 = arith.cmpi sge, %91, %164 : vector<24x16xi32>
    %c0_i32_64 = arith.constant 0 : i32
    %166 = vector.broadcast %c0_i32_64 : i32 to vector<24x16xi32>
    %167 = arith.select %165, %158, %166 : vector<24x16xi1>, vector<24x16xi32>
    %168 = arith.addi %163, %167 : vector<24x16xi32>
    %c9_i32 = arith.constant 9 : i32
    %169 = vector.broadcast %c9_i32 : i32 to vector<24x16xi32>
    %170 = arith.cmpi sge, %91, %169 : vector<24x16xi32>
    %c0_i32_65 = arith.constant 0 : i32
    %171 = vector.broadcast %c0_i32_65 : i32 to vector<24x16xi32>
    %172 = arith.select %170, %158, %171 : vector<24x16xi1>, vector<24x16xi32>
    %173 = arith.addi %168, %172 : vector<24x16xi32>
    %c0_i32_66 = arith.constant 0 : i32
    %174 = vector.broadcast %c0_i32_66 : i32 to vector<24x16xi32>
    %c1_i32_67 = arith.constant 1 : i32
    %175 = vector.broadcast %c1_i32_67 : i32 to vector<24x16xi32>
    %c3_i32_68 = arith.constant 3 : i32
    %176 = vector.broadcast %c3_i32_68 : i32 to vector<24x16xi32>
    %177 = arith.cmpi sge, %101, %176 : vector<24x16xi32>
    %c0_i32_69 = arith.constant 0 : i32
    %178 = vector.broadcast %c0_i32_69 : i32 to vector<24x16xi32>
    %179 = arith.select %177, %175, %178 : vector<24x16xi1>, vector<24x16xi32>
    %180 = arith.addi %174, %179 : vector<24x16xi32>
    %c6_i32_70 = arith.constant 6 : i32
    %181 = vector.broadcast %c6_i32_70 : i32 to vector<24x16xi32>
    %182 = arith.cmpi sge, %101, %181 : vector<24x16xi32>
    %c0_i32_71 = arith.constant 0 : i32
    %183 = vector.broadcast %c0_i32_71 : i32 to vector<24x16xi32>
    %184 = arith.select %182, %175, %183 : vector<24x16xi1>, vector<24x16xi32>
    %185 = arith.addi %180, %184 : vector<24x16xi32>
    %186 = arith.cmpi eq, %173, %185 : vector<24x16xi32>
    %187 = arith.andi %102, %186 : vector<24x16xi1>
    %cst_72 = arith.constant 0.333333343 : f32
    %cst_73 = arith.constant 0.000000e+00 : f32
    %188 = vector.broadcast %cst_72 : f32 to vector<24x16xf32>
    %189 = vector.broadcast %cst_73 : f32 to vector<24x16xf32>
    %190 = arith.select %187, %188, %189 : vector<24x16xi1>, vector<24x16xf32>
    %c0_i32_74 = arith.constant 0 : i32
    %191 = vector.broadcast %c0_i32_74 : i32 to vector<24x16xi32>
    %c1_i32_75 = arith.constant 1 : i32
    %192 = vector.broadcast %c1_i32_75 : i32 to vector<24x16xi32>
    %c4_i32_76 = arith.constant 4 : i32
    %193 = vector.broadcast %c4_i32_76 : i32 to vector<24x16xi32>
    %194 = arith.cmpi sge, %91, %193 : vector<24x16xi32>
    %c0_i32_77 = arith.constant 0 : i32
    %195 = vector.broadcast %c0_i32_77 : i32 to vector<24x16xi32>
    %196 = arith.select %194, %192, %195 : vector<24x16xi1>, vector<24x16xi32>
    %197 = arith.addi %191, %196 : vector<24x16xi32>
    %c8_i32_78 = arith.constant 8 : i32
    %198 = vector.broadcast %c8_i32_78 : i32 to vector<24x16xi32>
    %199 = arith.cmpi sge, %91, %198 : vector<24x16xi32>
    %c0_i32_79 = arith.constant 0 : i32
    %200 = vector.broadcast %c0_i32_79 : i32 to vector<24x16xi32>
    %201 = arith.select %199, %192, %200 : vector<24x16xi1>, vector<24x16xi32>
    %202 = arith.addi %197, %201 : vector<24x16xi32>
    %c0_i32_80 = arith.constant 0 : i32
    %203 = vector.broadcast %c0_i32_80 : i32 to vector<24x16xi32>
    %c1_i32_81 = arith.constant 1 : i32
    %204 = vector.broadcast %c1_i32_81 : i32 to vector<24x16xi32>
    %c4_i32_82 = arith.constant 4 : i32
    %205 = vector.broadcast %c4_i32_82 : i32 to vector<24x16xi32>
    %206 = arith.cmpi sge, %101, %205 : vector<24x16xi32>
    %c0_i32_83 = arith.constant 0 : i32
    %207 = vector.broadcast %c0_i32_83 : i32 to vector<24x16xi32>
    %208 = arith.select %206, %204, %207 : vector<24x16xi1>, vector<24x16xi32>
    %209 = arith.addi %203, %208 : vector<24x16xi32>
    %210 = arith.cmpi eq, %202, %209 : vector<24x16xi32>
    %211 = arith.andi %102, %210 : vector<24x16xi1>
    %cst_84 = arith.constant 2.500000e-01 : f32
    %cst_85 = arith.constant 0.000000e+00 : f32
    %212 = vector.broadcast %cst_84 : f32 to vector<24x16xf32>
    %213 = vector.broadcast %cst_85 : f32 to vector<24x16xf32>
    %214 = arith.select %211, %212, %213 : vector<24x16xi1>, vector<24x16xf32>
    %215 = tpu.concatenate %107, %156, %190, %214 in 0 : vector<24x16xf32>, vector<24x16xf32>, vector<24x16xf32>, vector<24x16xf32> -> vector<96x16xf32>
    %cst_86 = arith.constant dense<0.000000e+00> : vector<96x32xf32>
    %216 = tpu.matmul %215, %79, %cst_86 {dimension_numbers = #tpu.dot_dimension_numbers<[1], [0], [0], [1], [0, 0, 1, 1], [], []>} : vector<96x16xf32>, vector<16x32xf32>, vector<96x32xf32> -> vector<96x32xf32>
    %c0_87 = arith.constant 0 : index
    %c0_88 = arith.constant 0 : index
    %217 = vector.load %arg7[%c0_87, %c0_88] : memref<32x1xf32, #tpu.memory_space<vmem>>, vector<32x1xf32>
    %cst_89 = arith.constant dense<0.000000e+00> : vector<96x1xf32>
    %218 = tpu.matmul %216, %217, %cst_89 {dimension_numbers = #tpu.dot_dimension_numbers<[1], [0], [0], [1], [0, 0, 1, 1], [], []>} : vector<96x32xf32>, vector<32x1xf32>, vector<96x1xf32> -> vector<96x1xf32>
    %219 = vector.extract_strided_slice %218 {offsets = [0, 0], sizes = [24, 1], strides = [1, 1]} : vector<96x1xf32> to vector<24x1xf32>
    %220 = vector.extract_strided_slice %218 {offsets = [24, 0], sizes = [24, 1], strides = [1, 1]} : vector<96x1xf32> to vector<24x1xf32>
    %221 = vector.extract_strided_slice %218 {offsets = [48, 0], sizes = [24, 1], strides = [1, 1]} : vector<96x1xf32> to vector<24x1xf32>
    %222 = vector.extract_strided_slice %218 {offsets = [72, 0], sizes = [24, 1], strides = [1, 1]} : vector<96x1xf32> to vector<24x1xf32>
    %223 = tpu.concatenate %219, %220, %221, %222 in 1 : vector<24x1xf32>, vector<24x1xf32>, vector<24x1xf32>, vector<24x1xf32> -> vector<24x4xf32>
    %c0_90 = arith.constant 0 : index
    %c0_91 = arith.constant 0 : index
    %224 = vector.load %arg8[%c0_90, %c0_91] : memref<1x1xf32, #tpu.memory_space<vmem>>, vector<1x1xf32>
    %225 = vector.broadcast %224 : vector<1x1xf32> to vector<24x4xf32>
    %226 = arith.addf %223, %225 : vector<24x4xf32>
    %cst_92 = arith.constant dense<0xFF800000> : vector<24xf32>
    %227 = vector.multi_reduction <maximumf>, %226, %cst_92 [1] : vector<24x4xf32> to vector<24xf32>
    %228 = vector.shape_cast %227 : vector<24xf32> to vector<24x1xf32>
    %229 = vector.broadcast %228 : vector<24x1xf32> to vector<24x4xf32>
    %230 = arith.subf %226, %229 : vector<24x4xf32>
    %231 = math.exp %230 : vector<24x4xf32>
    %cst_93 = arith.constant dense<0.000000e+00> : vector<24xf32>
    %232 = vector.multi_reduction <add>, %231, %cst_93 [1] : vector<24x4xf32> to vector<24xf32>
    %233 = vector.shape_cast %232 : vector<24xf32> to vector<24x1xf32>
    %234 = tpu.reciprocal %233 {approx = true} : vector<24x1xf32> -> vector<24x1xf32>
    %235 = vector.broadcast %234 : vector<24x1xf32> to vector<24x4xf32>
    %236 = arith.mulf %231, %235 : vector<24x4xf32>
    %cst_94 = arith.constant dense<0.000000e+00> : vector<24x24xf32>
    %237 = tpu.matmul %236, %236, %cst_94 {dimension_numbers = #tpu.dot_dimension_numbers<[1], [1], [0], [0], [0, 0, 1, 0], [], []>} : vector<24x4xf32>, vector<24x4xf32>, vector<24x24xf32> -> vector<24x24xf32>
    %238 = tpu.iota {dimensions = array<i32: 0>} : vector<24x24xi32>
    %239 = tpu.iota {dimensions = array<i32: 1>} : vector<24x24xi32>
    %c0_i32_95 = arith.constant 0 : i32
    %240 = vector.broadcast %c0_i32_95 : i32 to vector<24x24xi32>
    %c1_i32_96 = arith.constant 1 : i32
    %241 = vector.broadcast %c1_i32_96 : i32 to vector<24x24xi32>
    %c12_i32_97 = arith.constant 12 : i32
    %242 = vector.broadcast %c12_i32_97 : i32 to vector<24x24xi32>
    %243 = arith.cmpi sge, %238, %242 : vector<24x24xi32>
    %c0_i32_98 = arith.constant 0 : i32
    %244 = vector.broadcast %c0_i32_98 : i32 to vector<24x24xi32>
    %245 = arith.select %243, %241, %244 : vector<24x24xi1>, vector<24x24xi32>
    %246 = arith.addi %240, %245 : vector<24x24xi32>
    %c0_i32_99 = arith.constant 0 : i32
    %247 = vector.broadcast %c0_i32_99 : i32 to vector<24x24xi32>
    %c1_i32_100 = arith.constant 1 : i32
    %248 = vector.broadcast %c1_i32_100 : i32 to vector<24x24xi32>
    %c12_i32_101 = arith.constant 12 : i32
    %249 = vector.broadcast %c12_i32_101 : i32 to vector<24x24xi32>
    %250 = arith.cmpi sge, %239, %249 : vector<24x24xi32>
    %c0_i32_102 = arith.constant 0 : i32
    %251 = vector.broadcast %c0_i32_102 : i32 to vector<24x24xi32>
    %252 = arith.select %250, %248, %251 : vector<24x24xi1>, vector<24x24xi32>
    %253 = arith.addi %247, %252 : vector<24x24xi32>
    %254 = arith.cmpi eq, %246, %253 : vector<24x24xi32>
    %cst_103 = arith.constant -1.000000e+30 : f32
    %255 = vector.broadcast %cst_103 : f32 to vector<24x24xf32>
    %256 = arith.select %254, %237, %255 : vector<24x24xi1>, vector<24x24xf32>
    %cst_104 = arith.constant dense<0xFF800000> : vector<24xf32>
    %257 = vector.multi_reduction <maximumf>, %256, %cst_104 [1] : vector<24x24xf32> to vector<24xf32>
    %258 = vector.shape_cast %257 : vector<24xf32> to vector<24x1xf32>
    %259 = vector.broadcast %258 : vector<24x1xf32> to vector<24x24xf32>
    %260 = arith.subf %256, %259 : vector<24x24xf32>
    %261 = math.exp %260 : vector<24x24xf32>
    %cst_105 = arith.constant dense<0.000000e+00> : vector<24xf32>
    %262 = vector.multi_reduction <add>, %261, %cst_105 [1] : vector<24x24xf32> to vector<24xf32>
    %263 = vector.shape_cast %262 : vector<24xf32> to vector<24x1xf32>
    %264 = tpu.reciprocal %263 {approx = true} : vector<24x1xf32> -> vector<24x1xf32>
    %265 = vector.broadcast %264 : vector<24x1xf32> to vector<24x24xf32>
    %266 = arith.mulf %261, %265 : vector<24x24xf32>
    %cst_106 = arith.constant dense<0.000000e+00> : vector<24x4xf32>
    %267 = tpu.matmul %266, %236, %cst_106 {dimension_numbers = #tpu.dot_dimension_numbers<[1], [0], [0], [1], [0, 0, 1, 1], [], []>} : vector<24x24xf32>, vector<24x4xf32>, vector<24x4xf32> -> vector<24x4xf32>
    %268 = vector.extract_strided_slice %267 {offsets = [0, 0], sizes = [24, 1], strides = [1, 1]} : vector<24x4xf32> to vector<24x1xf32>
    %269 = vector.broadcast %268 : vector<24x1xf32> to vector<24x16xf32>
    %270 = arith.mulf %107, %269 : vector<24x16xf32>
    %271 = vector.extract_strided_slice %267 {offsets = [0, 1], sizes = [24, 1], strides = [1, 1]} : vector<24x4xf32> to vector<24x1xf32>
    %272 = vector.broadcast %271 : vector<24x1xf32> to vector<24x16xf32>
    %273 = arith.mulf %156, %272 : vector<24x16xf32>
    %274 = arith.addf %270, %273 : vector<24x16xf32>
    %275 = vector.extract_strided_slice %267 {offsets = [0, 2], sizes = [24, 1], strides = [1, 1]} : vector<24x4xf32> to vector<24x1xf32>
    %276 = vector.broadcast %275 : vector<24x1xf32> to vector<24x16xf32>
    %277 = arith.mulf %190, %276 : vector<24x16xf32>
    %278 = arith.addf %274, %277 : vector<24x16xf32>
    %279 = vector.extract_strided_slice %267 {offsets = [0, 3], sizes = [24, 1], strides = [1, 1]} : vector<24x4xf32> to vector<24x1xf32>
    %280 = vector.broadcast %279 : vector<24x1xf32> to vector<24x16xf32>
    %281 = arith.mulf %214, %280 : vector<24x16xf32>
    %282 = arith.addf %278, %281 : vector<24x16xf32>
    %cst_107 = arith.constant dense<0.000000e+00> : vector<24x32xf32>
    %283 = tpu.matmul %282, %79, %cst_107 {dimension_numbers = #tpu.dot_dimension_numbers<[1], [0], [0], [1], [0, 0, 1, 1], [], []>} : vector<24x16xf32>, vector<16x32xf32>, vector<24x32xf32> -> vector<24x32xf32>
    %284 = tpu.iota {dimensions = array<i32: 0>} : vector<4x24xi32>
    %285 = tpu.iota {dimensions = array<i32: 1>} : vector<4x24xi32>
    %c0_i32_108 = arith.constant 0 : i32
    %286 = vector.broadcast %c0_i32_108 : i32 to vector<4x24xi32>
    %c1_i32_109 = arith.constant 1 : i32
    %287 = vector.broadcast %c1_i32_109 : i32 to vector<4x24xi32>
    %c2_i32_110 = arith.constant 2 : i32
    %288 = vector.broadcast %c2_i32_110 : i32 to vector<4x24xi32>
    %289 = arith.cmpi sge, %284, %288 : vector<4x24xi32>
    %c0_i32_111 = arith.constant 0 : i32
    %290 = vector.broadcast %c0_i32_111 : i32 to vector<4x24xi32>
    %291 = arith.select %289, %287, %290 : vector<4x24xi1>, vector<4x24xi32>
    %292 = arith.addi %286, %291 : vector<4x24xi32>
    %c2_i32_112 = arith.constant 2 : i32
    %293 = vector.broadcast %c2_i32_112 : i32 to vector<4x24xi32>
    %294 = arith.muli %292, %293 : vector<4x24xi32>
    %295 = arith.subi %284, %294 : vector<4x24xi32>
    %c0_i32_113 = arith.constant 0 : i32
    %296 = vector.broadcast %c0_i32_113 : i32 to vector<4x24xi32>
    %c1_i32_114 = arith.constant 1 : i32
    %297 = vector.broadcast %c1_i32_114 : i32 to vector<4x24xi32>
    %c12_i32_115 = arith.constant 12 : i32
    %298 = vector.broadcast %c12_i32_115 : i32 to vector<4x24xi32>
    %299 = arith.cmpi sge, %285, %298 : vector<4x24xi32>
    %c0_i32_116 = arith.constant 0 : i32
    %300 = vector.broadcast %c0_i32_116 : i32 to vector<4x24xi32>
    %301 = arith.select %299, %297, %300 : vector<4x24xi1>, vector<4x24xi32>
    %302 = arith.addi %296, %301 : vector<4x24xi32>
    %c12_i32_117 = arith.constant 12 : i32
    %303 = vector.broadcast %c12_i32_117 : i32 to vector<4x24xi32>
    %304 = arith.muli %302, %303 : vector<4x24xi32>
    %305 = arith.subi %285, %304 : vector<4x24xi32>
    %306 = arith.cmpi eq, %292, %302 : vector<4x24xi32>
    %c0_i32_118 = arith.constant 0 : i32
    %307 = vector.broadcast %c0_i32_118 : i32 to vector<4x24xi32>
    %c1_i32_119 = arith.constant 1 : i32
    %308 = vector.broadcast %c1_i32_119 : i32 to vector<4x24xi32>
    %c4_i32_120 = arith.constant 4 : i32
    %309 = vector.broadcast %c4_i32_120 : i32 to vector<4x24xi32>
    %310 = arith.cmpi sge, %305, %309 : vector<4x24xi32>
    %c0_i32_121 = arith.constant 0 : i32
    %311 = vector.broadcast %c0_i32_121 : i32 to vector<4x24xi32>
    %312 = arith.select %310, %308, %311 : vector<4x24xi1>, vector<4x24xi32>
    %313 = arith.addi %307, %312 : vector<4x24xi32>
    %c8_i32_122 = arith.constant 8 : i32
    %314 = vector.broadcast %c8_i32_122 : i32 to vector<4x24xi32>
    %315 = arith.cmpi sge, %305, %314 : vector<4x24xi32>
    %c0_i32_123 = arith.constant 0 : i32
    %316 = vector.broadcast %c0_i32_123 : i32 to vector<4x24xi32>
    %317 = arith.select %315, %308, %316 : vector<4x24xi1>, vector<4x24xi32>
    %318 = arith.addi %313, %317 : vector<4x24xi32>
    %319 = arith.cmpi eq, %318, %295 : vector<4x24xi32>
    %320 = arith.andi %306, %319 : vector<4x24xi1>
    %cst_124 = arith.constant 2.500000e-01 : f32
    %cst_125 = arith.constant 0.000000e+00 : f32
    %321 = vector.broadcast %cst_124 : f32 to vector<4x24xf32>
    %322 = vector.broadcast %cst_125 : f32 to vector<4x24xf32>
    %323 = arith.select %320, %321, %322 : vector<4x24xi1>, vector<4x24xf32>
    %cst_126 = arith.constant dense<0.000000e+00> : vector<4x32xf32>
    %324 = tpu.matmul %323, %283, %cst_126 {dimension_numbers = #tpu.dot_dimension_numbers<[1], [0], [0], [1], [0, 0, 1, 1], [], []>} : vector<4x24xf32>, vector<24x32xf32>, vector<4x32xf32> -> vector<4x32xf32>
    %325 = vector.extract_strided_slice %324 {offsets = [0, 0], sizes = [1, 32], strides = [1, 1]} : vector<4x32xf32> to vector<1x32xf32>
    %326 = vector.extract_strided_slice %324 {offsets = [1, 0], sizes = [1, 32], strides = [1, 1]} : vector<4x32xf32> to vector<1x32xf32>
    %327 = vector.extract_strided_slice %324 {offsets = [2, 0], sizes = [1, 32], strides = [1, 1]} : vector<4x32xf32> to vector<1x32xf32>
    %328 = vector.extract_strided_slice %324 {offsets = [3, 0], sizes = [1, 32], strides = [1, 1]} : vector<4x32xf32> to vector<1x32xf32>
    %329 = tpu.concatenate %325, %326, %327, %328 in 1 : vector<1x32xf32>, vector<1x32xf32>, vector<1x32xf32>, vector<1x32xf32> -> vector<1x128xf32>
    %c0_127 = arith.constant 0 : index
    %c0_128 = arith.constant 0 : index
    %330 = vector.load %arg9[%c0_127, %c0_128] : memref<1x128xf32, #tpu.memory_space<vmem>>, vector<1x128xf32>
    tpu.vector_store %arg9[%c0_127, %c0_128], %329 {strides = array<i32>} : memref<1x128xf32, #tpu.memory_space<vmem>>, vector<1x128xf32>,
    return
  }
  func.func @transform_0(%arg0: i32) -> (i32, i32) {
    %c0_i32 = arith.constant 0 : i32
    %c0_i32_0 = arith.constant 0 : i32
    %c0_i32_1 = arith.constant 0 : i32
    return %c0_i32, %c0_i32_0 : i32, i32
  }
  func.func @transform_1(%arg0: i32) -> (i32, i32) {
    %c0_i32 = arith.constant 0 : i32
    %c0_i32_0 = arith.constant 0 : i32
    %c0_i32_1 = arith.constant 0 : i32
    return %c0_i32, %c0_i32_0 : i32, i32
  }
  func.func @transform_2(%arg0: i32) -> (i32, i32) {
    %c0_i32 = arith.constant 0 : i32
    %c0_i32_0 = arith.constant 0 : i32
    %c0_i32_1 = arith.constant 0 : i32
    return %c0_i32, %c0_i32_0 : i32, i32
  }
  func.func @transform_3(%arg0: i32) -> (i32, i32) {
    %c0_i32 = arith.constant 0 : i32
    %c0_i32_0 = arith.constant 0 : i32
    %c0_i32_1 = arith.constant 0 : i32
    return %c0_i32, %c0_i32_0 : i32, i32
  }
  func.func @transform_4(%arg0: i32) -> (i32, i32) {
    %c0_i32 = arith.constant 0 : i32
    %c0_i32_0 = arith.constant 0 : i32
    %c0_i32_1 = arith.constant 0 : i32
    return %c0_i32, %c0_i32_0 : i32, i32
  }
  func.func @transform_5(%arg0: i32) -> (i32, i32) {
    %c0_i32 = arith.constant 0 : i32
    %c0_i32_0 = arith.constant 0 : i32
    %c0_i32_1 = arith.constant 0 : i32
    return %c0_i32, %c0_i32_0 : i32, i32
  }
  func.func @transform_6(%arg0: i32) -> (i32, i32) {
    %c0_i32 = arith.constant 0 : i32
    %c0_i32_0 = arith.constant 0 : i32
    %c0_i32_1 = arith.constant 0 : i32
    return %c0_i32, %c0_i32_0 : i32, i32
  }
  func.func @transform_7(%arg0: i32) -> (i32, i32) {
    %c0_i32 = arith.constant 0 : i32
    %c0_i32_0 = arith.constant 0 : i32
    %c0_i32_1 = arith.constant 0 : i32
    return %c0_i32, %c0_i32_0 : i32, i32
  }
  func.func @transform_8(%arg0: i32) -> (i32, i32) {
    %c0_i32 = arith.constant 0 : i32
    %c0_i32_0 = arith.constant 0 : i32
    %c0_i32_1 = arith.constant 0 : i32
    return %c0_i32, %c0_i32_0 : i32, i32
  }
}

</mosaic_0001>

<bundles_post_ra>
// kernel: tpu_custom_call.1
= control target key start
LH: loop header
LB: loop body
LE: loop exit
PB: predicated region body
PF: predicated region fallthrough
CT: control target
= control target key end

     0   :  { %s2554_s0 = inlined_call_operand.vmem [shape: s32[16,1], index: 0, kind: input, shape index: {}]   ;;  %s2555_s1 = inlined_call_operand.vmem [shape: f32[64,32], index: 1, kind: input, shape index: {}]   ;;  %s2556_s2 = inlined_call_operand.vmem [shape: f32[4,32], index: 2, kind: input, shape index: {}]   ;;  %s2557_s3 = inlined_call_operand.vmem [shape: f32[1,32], index: 3, kind: input, shape index: {}]   ;;  %s2558_s4 = inlined_call_operand.vmem [shape: f32[32,32], index: 4, kind: input, shape index: {}]   ;;  %s2559_s5 = inlined_call_operand.vmem [shape: f32[1,32], index: 5, kind: input, shape index: {}]   ;;  %s2560_s6 = inlined_call_operand.vmem [shape: f32[32,1], index: 6, kind: input, shape index: {}]   ;;  %s2561_s7 = inlined_call_operand.<no memory space> [shape: f32[1,1], index: 7, kind: input, shape index: {}]   ;;  %s2562_s8 = inlined_call_operand.hbm [shape: f32[1,128], index: 8, kind: output, shape index: {}]  }
   0x1   :  { %v13_v0 = vstv %s2561_s7 }
   0x2   :  { %14 = vst [vmem:[#allocation2] sm:$0x1] %v13_v0 }
   0x3   :  { %v34_v1 = vld [vmem:[%s2554_s0] sm:$0xff]  ;;  %v2032_v3 = vmov 0   ;;  %v47_v4 = vld [vmem:[%s2555_s1 + $0x8] sm:$0xff]  ;;  %v48_v5 = vld [vmem:[%s2555_s1 + $0x10] sm:$0xff] }
   0x4   :  { %v46_v2 = vld [vmem:[%s2555_s1] sm:$0xff]  ;;  %1970 = vset.pattern.permute.xlu0 %v2032_v3  ;;  %v49_v6 = vld [vmem:[%s2555_s1 + $0x18] sm:$0xff]  ;;  %1971 = vset.pattern.permute.xlu1 %v2032_v3  ;;  %v35_v7 = vld [vmem:[%s2554_s0 + $0x8] sm:$0xff] }
   0x5   :  { %37 = vperm.xlu0 %1970, %v34_v1   ;;  %v1903_v8 = vpack.c.bf16 %v47_v4, %v46_v2  ;;  %v1907_v9 = vpack.c.bf16 %v49_v6, %v48_v5  ;;  %v50_v10 = vld [vmem:[%s2555_s1 + $0x20] sm:$0xff]  ;;  %v51_v11 = vld [vmem:[%s2555_s1 + $0x28] sm:$0xff] }
   0x6   :  { %15 = vsyncpa [#allocation4], 0  ;;  %v1911_v12 = vpack.c.bf16 %v51_v11, %v50_v10  ;;  %v52_v13 = vld [vmem:[%s2555_s1 + $0x30] sm:$0xff]  ;;  %v53_v14 = vld [vmem:[%s2555_s1 + $0x38] sm:$0xff]  ;;  %v32_v16 = vlaneseq  ;;  %vm2563_vm0 = vcmask 523264   ;;  %v2033_v19 = vmov 0.0  }
   0x7   :  { %1904 = vmatprep.subr.bf16.mxu0 %v1903_v8  ;;  %v1915_v15 = vpack.c.bf16 %v53_v14, %v52_v13  ;;  %vm283_vm7 = vcmask 130048   ;;  %v456_v55 = vld [vmem:[%s2558_s4] sm:$0xff]  ;;  %v457_v56 = vld [vmem:[%s2558_s4 + $0x8] sm:$0xff]  ;;  %v458_v58 = vld [vmem:[%s2558_s4 + $0x10] sm:$0xff]  ;;  %s2035_s24 = smov 2   ;;  %s2036_s1 = smov 3  }
   0x8   :  { %1906 = vmatpush3.bf16.msra.mxu0 %v1903_v8  ;;  %v2126_v17 = vand.u32 127, %v32_v16  ;;  %v2134_v23 = vshrl.u32 %v32_v16, 7  ;;  %v1923_v57 = vpack.c.bf16 %v457_v56, %v456_v55  ;;  %v459_v59 = vld [vmem:[%s2558_s4 + $0x18] sm:$0xff]  ;;  %v1622_v63 = vld [vmem:[%s2556_s2] ss:$0 sm:$0xff]  ;;  %s2042_s25 = smov 32  }
   0x9   :  { %40 = vperm.xlu0 %1970, %v35_v7   ;;  %1908 = vmatprep.subr.bf16.mxu0 %v1907_v9  ;;  %v1927_v60 = vpack.c.bf16 %v459_v59, %v458_v58  ;;  %v1623_v0 = vld [vmem:[%s2556_s2 + $0x1] ss:$0 sm:$0xff]  ;;  %v1624_v8 = vld [vmem:[%s2556_s2 + $0x2] ss:$0 sm:$0xff]  ;;  %s2043_s26 = smov 64   ;;  %s2044_s27 = smov 96  }
   0xa   :  { %vm241_vm3 = vcmp.ge.s32.totalorder %v2126_v17, 8  ;;  %vm251_vm4 = vcmp.eq.s32.totalorder %v2126_v17, %v2134_v23  ;;  %v2150_v26 = vadd.s32 16, %v2134_v23  ;;  %v140_v27 = vadd.s32 24, %v2134_v23  ;;  %s2045_s28 = smov [#allocation3]  }
   0xb   :  { %vm2141_vm5 = vmneg %vm241_vm3  ;;  %v141_v29 = vadd.s32 32, %v2134_v23  ;;  %v2156_v30 = vadd.s32 8, %v2134_v23  ;;  %v142_v32 = vadd.s32 40, %v2134_v23  ;;  %v143_v35 = vadd.s32 48, %v2134_v23  ;;  %s1590_s29 = sshll.u32 %s2045_s28, 4  ;;  %s1591_s29 = int_to_ptr.vmem [resolvable:$true] %s1590_s29 }
   0xc   :  { %1910 = vmatpush3.bf16.msra.mxu0 %v1907_v9  ;;  %vm267_vm6 = vmand %vm251_vm4, %vm2141_vm5  ;;  %v1600_v28 = vadd.s32 4294967280, %v2150_v26  ;;  %v1601_v31 = vadd.s32 4294967280, %v140_v27  ;;  %v144_v38 = vadd.s32 56, %v2134_v23  ;;  %s2008_s30 = scalar_lea.vmem %s1591_s29, 16  ;;  %s2012_s9 = scalar_lea.vmem %s1591_s29, 32 }
   0xd   :  { %1912 = vmatprep.subr.bf16.mxu0 %v1911_v12  ;;  %v275_v25 = vsel %vm267_vm6, 1.0, %v2033_v19  ;;  %v1602_v34 = vadd.s32 4294967264, %v141_v29  ;;  %vm252_vm8 = vcmp.eq.s32.totalorder %v2126_v17, %v2156_v30  ;;  %v1603_v37 = vadd.s32 4294967264, %v142_v32  ;;  %p2009_p0 = scmp.ne.s32.totalorder %s1591_s29, %s2008_s30  ;;  %p2013_p1 = scmp.lt.s32.totalorder %s1591_s29, %s1591_s29 }
   0xe   :  { %1780 = vmatprep.mubr.msk.f32.mxu1 %vm283_vm7, %v275_v25  ;;  %v245_v33 = vadd.s32 1, %v1600_v28  ;;  %v246_v36 = vadd.s32 1, %v1601_v31  ;;  %v1604_v41 = vadd.s32 4294967248, %v143_v35  ;;  %vm268_vm10 = vmand %vm252_vm8, %vm241_vm3  ;;  %v1605_v45 = vadd.s32 4294967248, %v144_v38  ;;  %v1626_v28 = vld [vmem:[%s2557_s3] ss:$0 sm:$0xff]  ;;  %p2014_p2 = scmp.lt.s32.totalorder %s2012_s9, %s2008_s30 }
   0xf   :  { %v247_v40 = vadd.s32 2, %v1602_v34  ;;  %v248_v44 = vadd.s32 2, %v1603_v37  ;;  %v276_v47 = vsel %vm268_vm10, 1.0, %v2033_v19  ;;  %vm467_vm10 = vcmask 261120  }
  0x10   :  { %1914 = vmatpush3.bf16.msra.mxu0 %v1911_v12  ;;  %vm253_vm9 = vcmp.eq.s32.totalorder %v2126_v17, %v245_v33  ;;  %vm254_vm12 = vcmp.eq.s32.totalorder %v2126_v17, %v246_v36  ;;  %v249_v46 = vadd.s32 3, %v1604_v41  ;;  %v250_v49 = vadd.s32 3, %v1605_v45  ;;  %p2015_p3 = por %p2014_p2, %p2013_p1 }
  0x11   :  { %1916 = vmatprep.subr.bf16.mxu0 %v1915_v15  ;;  %vm269_vm11 = vmand %vm253_vm9, %vm2141_vm5  ;;  %vm255_vm13 = vcmp.eq.s32.totalorder %v2126_v17, %v247_v40  ;;  %v2233_v34 = vsel %vm241_vm3, 1, %v2032_v3 }
  0x12   :  { %v277_v48 = vsel %vm269_vm11, 1.0, %v2033_v19  ;;  %vm270_vm14 = vmand %vm254_vm12, %vm241_vm3  ;;  %vm258_vm8 = vcmp.eq.s32.totalorder %v2126_v17, %v250_v49  ;;  %vm550_vm11 = vcmp.ge.s32.totalorder %v2156_v30, 12  ;;  %v561_v36 = vmul.u32 8, %v2233_v34  ;;  %p2016_p4 = pnand %p2015_p3, %p2009_p0 }
  0x13   :  { %vm271_vm15 = vmand %vm255_vm13, %vm2141_vm5  ;;  %v278_v50 = vsel %vm270_vm14, 1.0, %v2033_v19  ;;  %v2228_v33 = vsel %vm550_vm11, 1, %v2032_v3 }
  0x14   :  { %1918 = vmatpush3.bf16.msra.mxu0 %v1915_v15  ;;  %v279_v51 = vsel %vm271_vm15, 1.0, %v2033_v19  ;;  %vm274_vm9 = vmand %vm258_vm8, %vm241_vm3  ;;  %v1625_v15 = vld [vmem:[%s2556_s2 + $0x3] ss:$0 sm:$0xff]  ;;  %v556_v35 = vmul.u32 12, %v2228_v33  ;;  %v2238_v37 = vsub.s32 %v2126_v17, %v561_v36 }
  0x15   :  { %v282_v54 = vsel %vm274_vm9, 1.0, %v2033_v19 }
  0x16   :  { %v559_v38 = vsub.s32 %v2156_v30, %v556_v35  ;;  %vm566_vm12 = vcmp.eq.s32.totalorder %v2134_v23, %v2238_v37  ;;  %vm617_vm13 = vcmp.ge.s32.totalorder %v2238_v37, 2  ;;  %vm619_vm14 = vcmp.ge.s32.totalorder %v2238_v37, 4 }
  0x17   :  { %vm569_vm15 = vmand %vm2141_vm5, %vm566_vm12  ;;  %v618_v41 = vsel %vm617_vm13, 1, %v2032_v3  ;;  %vm622_vm9 = vcmp.ge.s32.totalorder %v2238_v37, 6 }
  0x18   :  { %v2254_v30 = vsel %vm569_vm15, 1.0, %v2033_v19  ;;  %vm591_vm12 = vcmp.ge.s32.totalorder %v559_v38, 6  ;;  %vm600_vm15 = vcmp.ge.s32.totalorder %v559_v38, 8  ;;  %vm609_vm13 = vcmp.ge.s32.totalorder %v559_v38, 10 }
  0x19   :  { %v594_v45 = vsel %vm591_vm12, 1, %v2032_v3  ;;  %vm635_vm12 = vcmp.ge.s32.totalorder %v559_v38, 3 }
  0x84   :  { %v38_v18 = vpop.permute.xlu0 %37 }
  0x85   :  { %vm42_vm1 = vcmp.eq.s32.totalorder %v2126_v17, %v38_v18 }
  0x86   :  { %v44_v20 = vsel %vm42_vm1, 1.0, %v2033_v19  ;;  %vm256_vm1 = vcmp.eq.s32.totalorder %v2126_v17, %v248_v44 }
  0x87   :  { %1773 = vmatprep.mubr.msk.f32.mxu0 %vm2563_vm0, %v44_v20  ;;  %vm272_vm4 = vmand %vm256_vm1, %vm241_vm3  ;;  %vm564_vm1 = vcmp.eq.s32.totalorder %v2228_v33, %v2233_v34 }
  0x88   :  { %v41_v21 = vpop.permute.xlu0 %40  ;;  %v280_v52 = vsel %vm272_vm4, 1.0, %v2033_v19  ;;  %vm576_vm4 = vcmp.ge.s32.totalorder %v559_v38, 2 }
  0x89   :  { %vm43_vm2 = vcmp.eq.s32.totalorder %v2126_v17, %v41_v21 }
  0x8a   :  { %v45_v22 = vsel %vm43_vm2, 1.0, %v2033_v19  ;;  %vm257_vm2 = vcmp.eq.s32.totalorder %v2126_v17, %v249_v46  ;;  %v603_v46 = vsel %vm600_vm15, 1, %v2032_v3 }
  0x8b   :  { %1774 = vmatmul.mubr.msk.f32.vlgmr.msra.gmra.mrb[0].mxu0 %vm2563_vm0, %v45_v22  ;;  %vm273_vm6 = vmand %vm257_vm2, %vm2141_vm5  ;;  %vm567_vm2 = vcmp.eq.s32.totalorder %v559_v38, %v2238_v37  ;;  %vm634_vm0 = vcmp.ge.s32.totalorder %v2134_v23, 3 }
  0x8c   :  { %v281_v53 = vsel %vm273_vm6, 1.0, %v2033_v19  ;;  %vm582_vm6 = vcmp.ge.s32.totalorder %v559_v38, 4  ;;  %vm2259_vm8 = vmand %vm564_vm1, %vm567_vm2  ;;  %1807 = vmatprep.mubr.msk.f32.mxu0 %vm283_vm7, %v2254_v30  ;;  %v637_v34 = vsel %vm634_vm0, 1, %v2032_v3 }
 0x15e   :  { %v1775_v39 = vpop.f32.mrb[0].mxu0 }
 0x15f   :  { %v127_v42 = vpop.f32.mrb[1].mxu0 }
 0x160   :  { %v1919_v43 = vpack.c.bf16 %v1775_v39, %v127_v42  ;;  %v2251_v39 = vadd.s32 4294967284, %v2150_v26  ;;  %v2267_v42 = vsel %vm619_vm14, 1, %v2032_v3  ;;  %v579_v26 = vsel %vm576_vm4, 1, %v2032_v3 }
 0x162   :  { %1920 = vmatprep.subr.bf16.mxu1 %v1919_v43  ;;  %vm568_vm11 = vcmp.eq.s32.totalorder %v2251_v39, %v2238_v37  ;;  %vm592_vm14 = vcmp.ge.s32.totalorder %v2251_v39, 6  ;;  %vm601_vm2 = vcmp.ge.s32.totalorder %v2251_v39, 8  ;;  %vm610_vm4 = vcmp.ge.s32.totalorder %v2251_v39, 10 }
 0x163   :  { %1922 = vmatpush3.bf16.msra.mxu1 %v1919_v43  ;;  %v585_v43 = vsel %vm582_vm6, 1, %v2032_v3  ;;  %v613_v55 = vsel %vm610_vm4, 1, %v2032_v3  ;;  %vm652_vm6 = vcmp.ge.s32.totalorder %v2238_v37, 3 }
 0x164   :  { %1924 = vmatprep.subr.bf16.mxu1 %v1923_v57  ;;  %v588_v44 = vadd.s32 %v585_v43, %v579_v26  ;;  %v653_v59 = vsel %vm652_vm6, 1, %v2032_v3 }
 0x166   :  { %1781 = vmatmul.mubr.msk.f32.vlgmr.msra.gmra.mrb[0].mxu1 %vm283_vm7, %v276_v47  ;;  %v621_v47 = vadd.s32 %v2267_v42, %v618_v41  ;;  %v597_v49 = vadd.s32 %v594_v45, %v588_v44 }
 0x167   :  { %1783 = vmatprep.mubr.msk.f32.mxu1 %vm283_vm7, %v277_v48  ;;  %1926 = vmatpush3.bf16.msra.mxu1 %v1923_v57  ;;  %v623_v48 = vsel %vm622_vm9, 1, %v2032_v3  ;;  %vm644_vm9 = vcmp.ge.s32.totalorder %v559_v38, 9  ;;  %v2361_v38 = vsel %vm2259_vm8, 1.0, %v2033_v19 }
 0x168   :  { %1928 = vmatprep.subr.bf16.mxu1 %v1927_v60  ;;  %v2286_v57 = vadd.s32 %v623_v48, %v621_v47  ;;  %v1657_v47 = vld [vmem:[#allocation2] ss:$0 sm:$0xff] }
 0x169   :  { %1057 = vperm.xlu1 %1971, %v1657_v47  }
 0x16a   :  { %1784 = vmatmul.mubr.msk.f32.gmra.mrb[2].mxu1 %vm283_vm7, %v278_v50  ;;  %v595_v50 = vsel %vm592_vm14, 1, %v2032_v3 }
 0x16b   :  { %1786 = vmatprep.mubr.msk.f32.mxu1 %vm283_vm7, %v279_v51  ;;  %1930 = vmatpush3.bf16.msra.mxu1 %v1927_v60  ;;  %v612_v51 = vsel %vm609_vm13, 1, %v2032_v3  ;;  %v638_v60 = vsel %vm635_vm12, 1, %v2032_v3  ;;  %vm645_vm13 = vcmp.ge.s32.totalorder %v2251_v39, 9 }
 0x16e   :  { %1787 = vmatmul.mubr.msk.f32.gmra.mrb[4].mxu1 %vm283_vm7, %v280_v52  ;;  %v598_v52 = vadd.s32 2, %v595_v50 }
 0x16f   :  { %1789 = vmatprep.mubr.msk.f32.mxu1 %vm283_vm7, %v281_v53  ;;  %v606_v53 = vadd.s32 %v603_v46, %v597_v49 }
 0x171   :  { %v615_v58 = vadd.s32 %v612_v51, %v606_v53 }
 0x172   :  { %1790 = vmatmul.mubr.msk.f32.gmra.mrb[6].mxu1 %vm283_vm7, %v282_v54  ;;  %v604_v54 = vsel %vm601_vm2, 1, %v2032_v3 }
 0x173   :  { %v607_v56 = vadd.s32 %v604_v54, %v598_v52  ;;  %vm626_vm15 = vcmp.eq.s32.totalorder %v615_v58, %v2286_v57 }
 0x174   :  { %vm2298_vm14 = vmand %vm564_vm1, %vm626_vm15 }
 0x175   :  { %v2379_v39 = vsel %vm2298_vm14, 0.5, %v2033_v19 }
 0x239   :  { %v1782_v61 = vpop.f32.mrb[0].mxu1 }
 0x23a   :  { %v374_v62 = vpop.f32.mrb[1].mxu1  ;;  %v419_v2 = vmul.f32 %v1782_v61, %v1622_v63  ;;  %v616_v61 = vadd.s32 %v613_v55, %v607_v56 }
 0x23b   :  { %v418_v6 = vmul.f32 %v1622_v63, %v374_v62  ;;  %v2290_v62 = vadd.s32 %v653_v59, %v623_v48  ;;  %v641_v63 = vadd.s32 %v638_v60, %v594_v45 }
 0x23c   :  { %vm627_vm2 = vcmp.eq.s32.totalorder %v616_v61, %v2286_v57 }
 0x23d   :  { %v1785_v1 = vpop.f32.mrb[2].mxu1  ;;  %vm630_vm8 = vmand %vm241_vm3, %vm627_vm2 }
 0x23e   :  { %v426_v4 = vmul.f32 %v1785_v1, %v1623_v0  ;;  %v384_v5 = vpop.f32.mrb[3].mxu1  ;;  %v642_v1 = vadd.s32 1, %v595_v50  ;;  %v2392_v40 = vsel %vm630_vm8, 0.5, %v2033_v19 }
 0x23f   :  { %v425_v7 = vmul.f32 %v1623_v0, %v384_v5  ;;  %v647_v0 = vsel %vm644_vm9, 1, %v2032_v3  ;;  %v648_v5 = vsel %vm645_vm13, 1, %v2032_v3 }
 0x240   :  { %v428_v9 = vadd.f32 %v426_v4, %v419_v2  ;;  %v650_v4 = vadd.s32 %v647_v0, %v641_v63 }
 0x241   :  { %v427_v10 = vadd.f32 %v425_v7, %v418_v6  ;;  %v1788_v11 = vpop.f32.mrb[4].mxu1  ;;  %v651_v6 = vadd.s32 %v648_v5, %v642_v1 }
 0x242   :  { %v435_v12 = vmul.f32 %v1788_v11, %v1624_v8  ;;  %v394_v13 = vpop.f32.mrb[5].mxu1  ;;  %vm656_vm4 = vcmp.eq.s32.totalorder %v650_v4, %v2290_v62  ;;  %v837_v11 = vld [vmem:[%s2560_s6] sm:$0xff] }
 0x243   :  { %v434_v14 = vmul.f32 %v1624_v8, %v394_v13  ;;  %vm2308_vm6 = vmand %vm564_vm1, %vm656_vm4  ;;  %vm657_vm12 = vcmp.eq.s32.totalorder %v651_v6, %v2290_v62  ;;  %v665_v8 = vadd.s32 %v603_v46, %v585_v43  ;;  %v839_v13 = vld [vmem:[%s2560_s6 + $0x10] sm:$0xff]  ;;  %vm581_vm4 = vcmp.ge.s32.totalorder %v2134_v23, 4 }
 0x244   :  { %v437_v16 = vadd.f32 %v435_v12, %v428_v9  ;;  %v666_v9 = vadd.s32 1, %v604_v54  ;;  %v838_v12 = vld [vmem:[%s2560_s6 + $0x8] sm:$0xff]  ;;  %vm660_vm14 = vmand %vm241_vm3, %vm657_vm12  ;;  %v2409_v43 = vsel %vm2308_vm6, 0.33333334, %v2033_v19  ;;  %vm1046_vm12 = vcmask 23552  }
 0x245   :  { %v436_v18 = vadd.f32 %v434_v14, %v427_v10  ;;  %v1791_v20 = vpop.f32.mrb[6].mxu1  ;;  %vm668_vm9 = vcmp.eq.s32.totalorder %v665_v8, %v2267_v42  ;;  %v1935_v14 = vpack.c.bf16 %v838_v12, %v837_v11  ;;  %v2412_v44 = vsel %vm660_vm14, 0.33333334, %v2033_v19  ;;  %v1058_v8 = vpop.permute.xlu1 %1057 }
 0x246   :  { %v444_v21 = vmul.f32 %v1791_v20, %v1625_v15  ;;  %v404_v22 = vpop.f32.mrb[7].mxu1  ;;  %vm2317_vm15 = vmand %vm564_vm1, %vm668_vm9  ;;  %vm669_vm13 = vcmp.eq.s32.totalorder %v666_v9, %v2267_v42  ;;  %vm575_vm1 = vcmp.ge.s32.totalorder %v2134_v23, 2  ;;  %v584_v20 = vsel %vm581_vm4, 1, %v2032_v3 }
 0x247   :  { %v443_v25 = vmul.f32 %v1625_v15, %v404_v22  ;;  %v840_v15 = vld [vmem:[%s2560_s6 + $0x18] sm:$0xff]  ;;  %1936 = vmatprep.subr.bf16.mxu1 %v1935_v14  ;;  %vm590_vm9 = vcmp.ge.s32.totalorder %v2134_v23, 6  ;;  %v1627_v22 = vld [vmem:[%s2559_s5] ss:$0 sm:$0xff]  ;;  %vm667_vm2 = vcmp.eq.s32.totalorder %v584_v20, %v2267_v42  ;;  %v2426_v46 = vsel %vm2317_vm15, 0.25, %v2033_v19  ;;  %vm672_vm6 = vmand %vm241_vm3, %vm669_vm13  ;;  %s2034_s5 = smov 1  }
 0x248   :  { %v446_v27 = vadd.f32 %v444_v21, %v437_v16  ;;  %v1939_v16 = vpack.c.bf16 %v840_v15, %v839_v13  ;;  %v2437_v24 = vsel %vm672_vm6, 0.25, %v2033_v19  ;;  %vm1063_vm15 = vcmask 31744  }
 0x249   :  { %v445_v29 = vadd.f32 %v443_v25, %v436_v18  ;;  %v2337_v18 = vsel %vm575_vm1, 1, %v2032_v3  ;;  %v593_v25 = vsel %vm590_vm9, 1, %v2032_v3  ;;  %vm571_vm1 = vmand %vm241_vm3, %vm568_vm11  ;;  %vm1038_vm3 = vcmask 7168  }
 0x24a   :  { %v455_v32 = vadd.f32 %v1626_v28, %v446_v27  ;;  %v587_v21 = vadd.s32 %v584_v20, %v2337_v18  ;;  %v640_v36 = vadd.s32 %v637_v34, %v593_v25  ;;  %v2364_v41 = vsel %vm571_vm1, 1.0, %v2033_v19  ;;  %vm670_vm1 = vmand %vm2141_vm5, %vm667_vm2 }
 0x24b   :  { %v454_v31 = vadd.f32 %v1626_v28, %v445_v29  ;;  %v2421_v45 = vsel %vm670_vm1, 0.25, %v2033_v19  ;;  %vm2038_vm13 = vmmov 0   ;;  %vm1581_vm6 = vcmask 785408  }
 0x24c   :  { %vm655_vm11 = vcmp.eq.s32.totalorder %v640_v36, %v2290_v62 }
 0x24d   :  { %1800 = vmatprep.mubr.msk.f32.mxu1 %vm467_vm10, %v454_v31  ;;  %v596_v31 = vadd.s32 %v593_v25, %v587_v21  ;;  %vm658_vm9 = vmand %vm2141_vm5, %vm655_vm11  ;;  %vm1194_vm11 = vcmask 195584  }
 0x24e   :  { %1801 = vmatmul.mubr.msk.f32.vlgmr.msra.gmra.mrb[8].mxu1 %vm467_vm10, %v455_v32  ;;  %v2395_v26 = vsel %vm658_vm9, 0.33333334, %v2033_v19 }
 0x24f   :  { %1938 = vmatpush3.bf16.msra.mxu1 %v1935_v14  ;;  %vm625_vm4 = vcmp.eq.s32.totalorder %v596_v31, %v2286_v57 }
 0x250   :  { %1940 = vmatprep.subr.bf16.mxu1 %v1939_v16  ;;  %vm628_vm0 = vmand %vm2141_vm5, %vm625_vm4  ;;  %vm1042_vm5 = vcmask 15360  }
 0x251   :  { %v2374_v37 = vsel %vm628_vm0, 0.5, %v2033_v19  ;;  %vm1945_vm4 = vmpackc.low %vm1063_vm15, %vm1063_vm15  ;;  %vm1186_vm0 = vcmp.ge.s32.totalorder %v2126_v17, 12 }
 0x253   :  { %1942 = vmatpush3.bf16.msra.mxu1 %v1939_v16 }
 0x321   :  { %v1802_v27 = vpop.f32.mrb[8].mxu1 }
 0x322   :  { %v546_v28 = vadd.f32 %v1802_v27, %v1627_v22  ;;  %v540_v29 = vpop.f32.mrb[9].mxu1 }
 0x323   :  { %v541_v32 = vadd.f32 %v1627_v22, %v540_v29 }
 0x325   :  { %v2348_v35 = vpack.c.bf16 %v546_v28, %v541_v32 }
 0x327   :  { %1932 = vmatprep.subr.bf16.mxu0 %v2348_v35 }
 0x328   :  { %1934 = vmatpush3.bf16.msra.mxu0 %v2348_v35 }
 0x32b   :  { %1808 = vmatmul.mubr.msk.f32.vlgmr.msra.gmra.mrb[2].mxu0 %vm283_vm7, %v2361_v38 }
 0x32c   :  { %1810 = vmatprep.mubr.msk.f32.mxu0 %vm283_vm7, %v2364_v41 }
 0x32f   :  { %1811 = vmatmul.mubr.msk.f32.gmra.mrb[4].mxu0 %vm283_vm7, %v2374_v37 }
 0x330   :  { %1813 = vmatprep.mubr.msk.f32.mxu0 %vm283_vm7, %v2379_v39 }
 0x333   :  { %1814 = vmatmul.mubr.msk.f32.gmra.mrb[6].mxu0 %vm283_vm7, %v2392_v40 }
 0x334   :  { %1816 = vmatprep.mubr.msk.f32.mxu0 %vm283_vm7, %v2395_v26 }
 0x337   :  { %1817 = vmatmul.mubr.msk.f32.gmra.mrb[8].mxu0 %vm283_vm7, %v2409_v43 }
 0x338   :  { %1819 = vmatprep.mubr.msk.f32.mxu0 %vm283_vm7, %v2412_v44 }
 0x33b   :  { %1820 = vmatmul.mubr.msk.f32.gmra.mrb[10].mxu0 %vm283_vm7, %v2421_v45 }
 0x33c   :  { %1822 = vmatprep.mubr.msk.f32.mxu0 %vm283_vm7, %v2426_v46 }
 0x33f   :  { %1823 = vmatmul.mubr.msk.f32.gmra.mrb[12].mxu0 %vm283_vm7, %v2437_v24 }
 0x340   :  { %1857 = vmatprep.mubr.msk.f32.mxu0 %vm2038_vm13, %v2033_v19 }
 0x3fe   :  { %v1809_v48 = vpop.f32.mrb[2].mxu0 }
 0x3ff   :  { %v778_v49 = vpop.f32.mrb[3].mxu0 }
 0x400   :  { %1833 = vmatprep.mubr.msk.f32.mxu1 %vm467_vm10, %v778_v49 }
 0x401   :  { %1834 = vmatmul.mubr.msk.f32.vlgmr.msra.gmra.mrb[10].mxu1 %vm467_vm10, %v1809_v48 }
 0x402   :  { %v1812_v42 = vpop.f32.mrb[4].mxu0 }
 0x403   :  { %v788_v50 = vpop.f32.mrb[5].mxu0 }
 0x404   :  { %1836 = vmatprep.mubr.msk.f32.mxu1 %vm467_vm10, %v788_v50 }
 0x405   :  { %1837 = vmatmul.mubr.msk.f32.gmra.mrb[12].mxu1 %vm467_vm10, %v1812_v42 }
 0x406   :  { %v1815_v51 = vpop.f32.mrb[6].mxu0 }
 0x407   :  { %v798_v52 = vpop.f32.mrb[7].mxu0 }
 0x408   :  { %1839 = vmatprep.mubr.msk.f32.mxu1 %vm467_vm10, %v798_v52 }
 0x409   :  { %1840 = vmatmul.mubr.msk.f32.gmra.mrb[14].mxu1 %vm467_vm10, %v1815_v51 }
 0x40a   :  { %v1818_v53 = vpop.f32.mrb[8].mxu0 }
 0x40b   :  { %v808_v54 = vpop.f32.mrb[9].mxu0 }
 0x40c   :  { %1842 = vmatprep.mubr.msk.f32.mxu1 %vm467_vm10, %v808_v54 }
 0x40d   :  { %1843 = vmatmul.mubr.msk.f32.gmra.mrb[16].mxu1 %vm467_vm10, %v1818_v53 }
 0x40e   :  { %v1821_v55 = vpop.f32.mrb[10].mxu0 }
 0x40f   :  { %v818_v56 = vpop.f32.mrb[11].mxu0 }
 0x410   :  { %1845 = vmatprep.mubr.msk.f32.mxu1 %vm467_vm10, %v818_v56 }
 0x411   :  { %1846 = vmatmul.mubr.msk.f32.gmra.mrb[18].mxu1 %vm467_vm10, %v1821_v55 }
 0x412   :  { %v1824_v57 = vpop.f32.mrb[12].mxu0 }
 0x413   :  { %v828_v58 = vpop.f32.mrb[13].mxu0 }
 0x414   :  { %1848 = vmatprep.mubr.msk.f32.mxu1 %vm467_vm10, %v828_v58 }
 0x415   :  { %1849 = vmatmul.mubr.msk.f32.gmra.mrb[20].mxu1 %vm467_vm10, %v1824_v57 }
 0x416   :  { %1872 = vmatprep.mubr.msk.f32.mxu1 %vm2038_vm13, %v2033_v19 }
 0x4d4   :  { %v1835_v59 = vpop.f32.mrb[10].mxu1 }
 0x4d5   :  { %v943_v60 = vpop.f32.mrb[11].mxu1 }
 0x4d8   :  { %v1838_v61 = vpop.f32.mrb[12].mxu1 }
 0x4d9   :  { %1005 = vrot.lane.b32.xlu1 %v1838_v61, %s2034_s5  ;;  %v953_v62 = vpop.f32.mrb[13].mxu1 }
 0x4dc   :  { %v1841_v63 = vpop.f32.mrb[14].mxu1 }
 0x4dd   :  { %v963_v0 = vpop.f32.mrb[15].mxu1 }
 0x4de   :  { %1007 = vrot.lane.b32.xlu0 %v963_v0, %s2034_s5 }
 0x4e0   :  { %v1844_v1 = vpop.f32.mrb[16].mxu1 }
 0x4e1   :  { %v973_v2 = vpop.f32.mrb[17].mxu1 }
 0x4e2   :  { %1019 = vrot.lane.b32.xlu0 %v1844_v1, %s2035_s24  ;;  %1017 = vrot.lane.b32.xlu1 %v973_v2, %s2035_s24  ;;  %v2037_v2 = vmov 0.0|0.0  }
 0x4e3   :  { %1943 = vmatprep.subr.bf16.mxu0 %v2037_v2  ;;  %1947 = vmatprep.subr.bf16.mxu1 %v2037_v2 }
 0x4e4   :  { %v1847_v4 = vpop.f32.mrb[18].mxu1 }
 0x4e5   :  { %v983_v5 = vpop.f32.mrb[19].mxu1 }
 0x4e6   :  { %1029 = vrot.lane.b32.xlu1 %v1847_v4, %s2036_s1 }
 0x4e8   :  { %v1850_v6 = vpop.f32.mrb[20].mxu1 }
 0x4e9   :  { %v993_v7 = vpop.f32.mrb[21].mxu1 }
 0x4ea   :  { %1009 = vrot.lane.b32.xlu1 %v1841_v63, %s2034_s5  ;;  %1031 = vrot.lane.b32.xlu0 %v993_v7, %s2036_s1 }
 0x4ee   :  { %1033 = vrot.lane.b32.xlu1 %v1850_v6, %s2036_s1  ;;  %1021 = vrot.lane.b32.xlu0 %v983_v5, %s2035_s24 }
 0x54b   :  { %v1006_v9 = vpop.permute.xlu1 %1005 }
 0x54c   :  { %v1039_v12 = vsel %vm1038_vm3, %v943_v60, %v1006_v9 }
 0x550   :  { %v1008_v10 = vpop.permute.xlu0 %1007 }
 0x551   :  { %v1040_v21 = vsel %vm1038_vm3, %v1835_v59, %v1008_v10 }
 0x554   :  { %v1018_v11 = vpop.permute.xlu1 %1017  ;;  %v1020_v13 = vpop.permute.xlu0 %1019 }
 0x555   :  { %v1043_v14 = vsel %vm1042_vm5, %v1039_v12, %v1018_v11  ;;  %v1044_v22 = vsel %vm1042_vm5, %v1040_v21, %v1020_v13 }
 0x558   :  { %v1030_v15 = vpop.permute.xlu1 %1029 }
 0x559   :  { %v1047_v16 = vsel %vm1046_vm12, %v1043_v14, %v1030_v15  ;;  %v2489_v14 = vsel %vm1186_vm0, 1, %v2032_v3 }
 0x55a   :  { %v1060_v20 = vadd.f32 %v1058_v8, %v1047_v16  ;;  %vm1189_vm8 = vcmp.eq.s32.totalorder %v2228_v33, %v2489_v14 }
 0x55c   :  { %v1010_v25 = vpop.permute.xlu1 %1009  ;;  %v1032_v27 = vpop.permute.xlu0 %1031  ;;  %v1064_v28 = vsel %vm1063_vm15, %v1060_v20, -inf }
 0x55d   :  { %v1048_v29 = vsel %vm1046_vm12, %v1044_v22, %v1032_v27  ;;  %1065 = vmax.xlane.f32.xlu0 %v1064_v28  ;;  %v1041_v32 = vsel %vm1038_vm3, %v953_v62, %v1010_v25  ;;  %vm2574_vm3 = vcmask 523264  }
 0x55e   :  { %v1061_v31 = vadd.f32 %v1058_v8, %v1048_v29 }
 0x560   :  { %v1034_v34 = vpop.permute.xlu1 %1033  ;;  %v1022_v36 = vpop.permute.xlu0 %1021  ;;  %v1067_v47 = vsel %vm1063_vm15, %v1061_v31, -inf }
 0x561   :  { %v1045_v48 = vsel %vm1042_vm5, %v1041_v32, %v1022_v36  ;;  %1068 = vmax.xlane.f32.xlu1 %v1067_v47 }
 0x562   :  { %v1049_v49 = vsel %vm1046_vm12, %v1045_v48, %v1034_v34 }
 0x563   :  { %v1062_v42 = vadd.f32 %v1058_v8, %v1049_v49 }
 0x565   :  { %v1070_v50 = vsel %vm1063_vm15, %v1062_v42, -inf }
 0x566   :  { %1071 = vmax.xlane.f32.xlu0 %v1070_v50 }
 0x5ea   :  { %v1066_v51 = vpop.xlane.xlu0 %1065 }
 0x5eb   :  { %v1073_v52 = vsub.f32 %v1060_v20, %v1066_v51 }
 0x5ed   :  { %v1076_v53 = vmul.f32 1.442695, %v1073_v52 }
 0x5ee   :  { %v1069_v54 = vpop.xlane.xlu1 %1068 }
 0x5ef   :  { %1984 = vpow2.f32 %v1076_v53  ;;  %v1074_v55 = vsub.f32 %v1061_v31, %v1069_v54 }
 0x5f1   :  { %v1078_v56 = vmul.f32 1.442695, %v1074_v55 }
 0x5f3   :  { %1986 = vpow2.f32 %v1078_v56  ;;  %v1072_v57 = vpop.xlane.xlu0 %1071 }
 0x5f4   :  { %v1075_v58 = vsub.f32 %v1062_v42, %v1072_v57 }
 0x5f6   :  { %v1080_v59 = vmul.f32 1.442695, %v1075_v58  ;;  %v2039_v58 = vmov 1  }
 0x5f7   :  { %1972 = vset.pattern.permute.xlu0 %v2039_v58 }
 0x5f8   :  { %1988 = vpow2.f32 %v1080_v59 }
 0x5f9   :  { %v1985_v60 = vpop.eup %1984 }
 0x5fa   :  { %v1082_v61 = vsel %vm1063_vm15, %v1985_v60, 0.0 }
 0x5fb   :  { %1083 = vadd.xlane.f32.xlu0 %v1082_v61 }
 0x5fd   :  { %v1987_v62 = vpop.eup %1986 }
 0x5fe   :  { %v1085_v63 = vsel %vm1063_vm15, %v1987_v62, 0.0 }
 0x5ff   :  { %1086 = vadd.xlane.f32.xlu1 %v1085_v63 }
 0x602   :  { %v1989_v0 = vpop.eup %1988 }
 0x603   :  { %v1088_v1 = vsel %vm1063_vm15, %v1989_v0, 0.0 }
 0x604   :  { %1089 = vadd.xlane.f32.xlu0 %v1088_v1 }
 0x688   :  { %v1084_v4 = vpop.xlane.xlu0 %1083 }
 0x689   :  { %1990 = vrcp.f32 %v1084_v4 }
 0x68c   :  { %v1087_v5 = vpop.xlane.xlu1 %1086 }
 0x68d   :  { %1992 = vrcp.f32 %v1087_v5 }
 0x691   :  { %v1090_v6 = vpop.xlane.xlu0 %1089 }
 0x692   :  { %1994 = vrcp.f32 %v1090_v6 }
 0x693   :  { %v1991_v7 = vpop.eup %1990 }
 0x694   :  { %v1094_v9 = vmul.f32 %v1991_v7, %v1985_v60 }
 0x697   :  { %v1993_v8 = vpop.eup %1992 }
 0x698   :  { %v1095_v10 = vmul.f32 %v1993_v8, %v1987_v62  ;;  %v2040_v8 = vmov 2  }
 0x69a   :  { %v1944_v11 = vpack.c.bf16 %v1095_v10, %v1094_v9 }
 0x69c   :  { %v1995_v12 = vpop.eup %1994  ;;  %1946 = vmatpush3.bf16.xpose.msk.msra.mxu0 %vm1945_vm4, %v1944_v11  ;;  %1949 = vmatpush3.bf16.msra.mxu1 %v1944_v11 }
 0x69d   :  { %1870 = vmatprep.subr.mxu1 %v2033_v19  ;;  %v1096_v13 = vmul.f32 %v1995_v12, %v1989_v0  ;;  %1855 = vmatprep.subr.mxu0 %v2033_v19  ;;  %v2041_v12 = vmov 3  }
 0x6a0   :  { %1871 = vmatpush3.msra.mxu1 %v1096_v13 }
 0x6a1   :  { %1953 = vmatprep.subr.bf16.mxu1 %v2037_v2 }
 0x6a4   :  { %1856 = vmatpush3.xpose.msk.msra.mxu0 %vm1063_vm15, %v1096_v13 }
 0x6a5   :  { %1950 = vmatprep.subr.bf16.mxu0 %v2037_v2 }
 0x6a7   :  { %1858 = vmatmul.mubr.msk.f32.vlgmr.msra.gmra.mrb[14].mxu0 %vm1063_vm15, %v1094_v9 }
 0x6a8   :  { %1952 = vmatpush3.bf16.msra.mxu0 %v2348_v35  ;;  %1860 = vmatprep.mubr.msk.f32.mxu0 %vm2038_vm13, %v2033_v19 }
 0x6ab   :  { %1861 = vmatmul.mubr.msk.f32.gmra.mrb[16].mxu0 %vm1063_vm15, %v1095_v10 }
 0x6ac   :  { %1863 = vmatprep.mubr.msk.f32.mxu0 %vm2038_vm13, %v2033_v19 }
 0x6af   :  { %1864 = vmatmul.mubr.msk.f32.gmra.mrb[18].mxu0 %vm1063_vm15, %v1096_v13 }
 0x6b0   :  { %1885 = vmatprep.mubr.msk.f32.mxu0 %vm2038_vm13, %v2033_v19 }
 0x77a   :  { %v1172_v35 = vpop.f32.mrb[14].mxu0 }
 0x77b   :  { %v1679_v15 = vsel %vm1186_vm0, -1e+30, %v1172_v35  ;;  %v1859_v16 = vpop.f32.mrb[15].mxu0 }
 0x77c   :  { %v1195_v20 = vsel %vm1194_vm11, %v1679_v15, -inf }
 0x77d   :  { %1196 = vmax.xlane.f32.xlu1 %v1195_v20 }
 0x77e   :  { %v1177_v21 = vpop.f32.mrb[16].mxu0 }
 0x77f   :  { %v1192_v22 = vsel %vm1189_vm8, %v1177_v21, -1e+30  ;;  %v1862_v25 = vpop.f32.mrb[17].mxu0 }
 0x780   :  { %v1198_v27 = vsel %vm1194_vm11, %v1192_v22, -inf }
 0x781   :  { %1199 = vmax.xlane.f32.xlu0 %v1198_v27 }
 0x782   :  { %v1182_v28 = vpop.f32.mrb[18].mxu0 }
 0x783   :  { %v1193_v29 = vsel %vm1186_vm0, %v1182_v28, -1e+30  ;;  %v1865_v31 = vpop.f32.mrb[19].mxu0 }
 0x784   :  { %v1201_v32 = vsel %vm1194_vm11, %v1193_v29, -inf }
 0x785   :  { %1202 = vmax.xlane.f32.xlu1 %v1201_v32 }
 0x80a   :  { %v1197_v34 = vpop.xlane.xlu1 %1196 }
 0x80b   :  { %v1204_v36 = vsub.f32 %v1679_v15, %v1197_v34 }
 0x80d   :  { %v1207_v47 = vmul.f32 1.442695, %v1204_v36 }
 0x80e   :  { %v1200_v48 = vpop.xlane.xlu0 %1199 }
 0x80f   :  { %1996 = vpow2.f32 %v1207_v47  ;;  %v1205_v49 = vsub.f32 %v1192_v22, %v1200_v48 }
 0x811   :  { %v1209_v33 = vmul.f32 1.442695, %v1205_v49 }
 0x812   :  { %v1203_v42 = vpop.xlane.xlu1 %1202 }
 0x813   :  { %1998 = vpow2.f32 %v1209_v33  ;;  %v1206_v50 = vsub.f32 %v1193_v29, %v1203_v42 }
 0x815   :  { %v1211_v51 = vmul.f32 1.442695, %v1206_v50 }
 0x817   :  { %2000 = vpow2.f32 %v1211_v51 }
 0x819   :  { %v1997_v52 = vpop.eup %1996 }
 0x81a   :  { %v1213_v53 = vsel %vm1194_vm11, %v1997_v52, 0.0 }
 0x81b   :  { %1214 = vadd.xlane.f32.xlu0 %v1213_v53 }
 0x81d   :  { %v1999_v54 = vpop.eup %1998 }
 0x81e   :  { %v1216_v55 = vsel %vm1194_vm11, %v1999_v54, 0.0 }
 0x81f   :  { %1217 = vadd.xlane.f32.xlu1 %v1216_v55 }
 0x821   :  { %v2001_v56 = vpop.eup %2000 }
 0x822   :  { %v1219_v57 = vsel %vm1194_vm11, %v2001_v56, 0.0 }
 0x823   :  { %1220 = vadd.xlane.f32.xlu0 %v1219_v57  ;;  %v1482_v57 = vmul.u32 12, %v2489_v14 }
 0x8a8   :  { %v1215_v59 = vpop.xlane.xlu0 %1214 }
 0x8a9   :  { %2002 = vrcp.f32 %v1215_v59 }
 0x8ac   :  { %v1218_v60 = vpop.xlane.xlu1 %1217 }
 0x8ad   :  { %2004 = vrcp.f32 %v1218_v60 }
 0x8b0   :  { %v1221_v61 = vpop.xlane.xlu0 %1220 }
 0x8b1   :  { %2006 = vrcp.f32 %v1221_v61 }
 0x8b3   :  { %v2003_v62 = vpop.eup %2002 }
 0x8b4   :  { %v1225_v63 = vmul.f32 %v2003_v62, %v1997_v52 }
 0x8b6   :  { %1873 = vmatmul.mubr.msk.f32.vlgmr.msra.gmra.mrb[22].mxu1 %vm1194_vm11, %v1225_v63 }
 0x8b7   :  { %v2005_v0 = vpop.eup %2004  ;;  %1875 = vmatprep.mubr.msk.f32.mxu1 %vm2038_vm13, %v2033_v19 }
 0x8b8   :  { %v1226_v1 = vmul.f32 %v2005_v0, %v1999_v54 }
 0x8ba   :  { %1876 = vmatmul.mubr.msk.f32.gmra.mrb[24].mxu1 %vm1194_vm11, %v1226_v1 }
 0x8bb   :  { %v2007_v2 = vpop.eup %2006  ;;  %1878 = vmatprep.mubr.msk.f32.mxu1 %vm2038_vm13, %v2033_v19 }
 0x8bc   :  { %v1227_v4 = vmul.f32 %v2007_v2, %v2001_v56 }
 0x8be   :  { %1879 = vmatmul.mubr.msk.f32.gmra.mrb[26].mxu1 %vm1194_vm11, %v1227_v4 }
 0x8bf   :  { %1900 = vmatprep.mubr.msk.f32.mxu1 %vm2038_vm13, %v2033_v19 }
 0x989   :  { %v1303_v5 = vpop.f32.mrb[22].mxu1 }
 0x98a   :  { %v1874_v6 = vpop.f32.mrb[23].mxu1  ;;  %1319 = vperm.xlu1 %1971, %v1303_v5   ;;  %1336 = vperm.xlu0 %1972, %v1303_v5  }
 0x98d   :  { %v1308_v7 = vpop.f32.mrb[24].mxu1 }
 0x98e   :  { %1973 = vset.pattern.permute.xlu1 %v2040_v8  ;;  %v1877_v9 = vpop.f32.mrb[25].mxu1  ;;  %1981 = vset.pattern.permute.xlu0 %v2040_v8 }
 0x98f   :  { %1354 = vperm.xlu1 %1973, %v1303_v5  }
 0x991   :  { %v1313_v10 = vpop.f32.mrb[26].mxu1 }
 0x992   :  { %1362 = vperm.xlu0 %1981, %v1313_v10   ;;  %v1880_v11 = vpop.f32.mrb[27].mxu1 }
 0x993   :  { %1974 = vset.pattern.permute.xlu1 %v2041_v12 }
 0x994   :  { %1372 = vperm.xlu1 %1974, %v1303_v5  }
 0x996   :  { %1983 = vset.pattern.permute.xlu0 %v2041_v12 }
 0x998   :  { %1975 = vset.pattern.permute.xlu1 %v2032_v3 }
 0x999   :  { %1324 = vperm.xlu1 %1975, %v1308_v7  }
 0x99d   :  { %1976 = vset.pattern.permute.xlu1 %v2039_v58 }
 0x99e   :  { %1340 = vperm.xlu1 %1976, %v1308_v7  }
 0x9a2   :  { %1977 = vset.pattern.permute.xlu1 %v2040_v8 }
 0x9a3   :  { %1358 = vperm.xlu1 %1977, %v1308_v7  }
 0x9a7   :  { %1978 = vset.pattern.permute.xlu1 %v2041_v12 }
 0x9a8   :  { %1376 = vperm.xlu1 %1978, %v1308_v7  }
 0x9ac   :  { %1979 = vset.pattern.permute.xlu1 %v2032_v3 }
 0x9ad   :  { %1329 = vperm.xlu1 %1979, %v1313_v10  }
 0x9b1   :  { %1980 = vset.pattern.permute.xlu1 %v2039_v58  ;;  %v1483_v58 = vsub.s32 %v2126_v17, %v1482_v57 }
 0x9b2   :  { %1344 = vperm.xlu1 %1980, %v1313_v10  }
 0x9b3   :  { %vm1485_vm9 = vcmp.ge.s32.totalorder %v1483_v58, 4  ;;  %vm1487_vm14 = vcmp.ge.s32.totalorder %v1483_v58, 8 }
 0x9b4   :  { %v1488_v59 = vsel %vm1487_vm14, 1, %v2032_v3 }
 0x9b6   :  { %1982 = vset.pattern.permute.xlu1 %v2041_v12 }
 0x9b7   :  { %1380 = vperm.xlu1 %1982, %v1313_v10  }
 0xa09   :  { %v1320_v13 = vpop.permute.xlu1 %1319  ;;  %v1337_v35 = vpop.permute.xlu0 %1336 }
 0xa0a   :  { %v1347_v15 = vmul.f32 %v1337_v35, %v2374_v37  ;;  %v1332_v16 = vmul.f32 %v1320_v13, %v2254_v30 }
 0xa0c   :  { %v1350_v22 = vadd.f32 %v1347_v15, %v1332_v16 }
 0xa0e   :  { %v1355_v20 = vpop.permute.xlu1 %1354 }
 0xa0f   :  { %v1365_v21 = vmul.f32 %v1355_v20, %v2395_v26 }
 0xa11   :  { %v1368_v27 = vadd.f32 %v1365_v21, %v1350_v22  ;;  %v1363_v42 = vpop.permute.xlu0 %1362 }
 0xa13   :  { %v1373_v25 = vpop.permute.xlu1 %1372 }
 0xa14   :  { %v1383_v28 = vmul.f32 %v1373_v25, %v2421_v45 }
 0xa16   :  { %v1386_v29 = vadd.f32 %v1383_v28, %v1368_v27 }
 0xa18   :  { %1886 = vmatmul.mubr.msk.f32.vlgmr.msra.gmra.mrb[20].mxu0 %vm283_vm7, %v1386_v29  ;;  %v1325_v31 = vpop.permute.xlu1 %1324 }
 0xa19   :  { %1888 = vmatprep.mubr.msk.f32.mxu0 %vm2038_vm13, %v2033_v19  ;;  %v1333_v30 = vmul.f32 %v1325_v31, %v2361_v38 }
 0xa1d   :  { %v1341_v32 = vpop.permute.xlu1 %1340 }
 0xa1e   :  { %v1348_v37 = vmul.f32 %v1341_v32, %v2379_v39 }
 0xa20   :  { %v1351_v36 = vadd.f32 %v1348_v37, %v1333_v30 }
 0xa22   :  { %v1359_v34 = vpop.permute.xlu1 %1358 }
 0xa23   :  { %v1366_v26 = vmul.f32 %v1359_v34, %v2409_v43  ;;  %v1367_v43 = vmul.f32 %v1363_v42, %v2412_v44  ;;  %v1486_v44 = vsel %vm1485_vm9, 1, %v2032_v3 }
 0xa24   :  { %v1489_v62 = vadd.s32 %v1488_v59, %v1486_v44 }
 0xa25   :  { %v1369_v48 = vadd.f32 %v1366_v26, %v1351_v36 }
 0xa27   :  { %v1377_v47 = vpop.permute.xlu1 %1376 }
 0xa28   :  { %v1384_v45 = vmul.f32 %v1377_v47, %v2426_v46 }
 0xa2a   :  { %v1387_v49 = vadd.f32 %v1384_v45, %v1369_v48 }
 0xa2c   :  { %1889 = vmatmul.mubr.msk.f32.gmra.mrb[22].mxu0 %vm283_vm7, %v1387_v49  ;;  %v1330_v33 = vpop.permute.xlu1 %1329 }
 0xa2d   :  { %1891 = vmatprep.mubr.msk.f32.mxu0 %vm2038_vm13, %v2033_v19  ;;  %v1334_v39 = vmul.f32 %v1330_v33, %v2364_v41  ;;  %v1480_v41 = vmul.u32 2, %v2337_v18 }
 0xa2f   :  { %v1481_v61 = vsub.s32 %v2134_v23, %v1480_v41 }
 0xa31   :  { %v1345_v50 = vpop.permute.xlu1 %1344  ;;  %vm1490_vm2 = vcmp.eq.s32.totalorder %v1489_v62, %v1481_v61 }
 0xa32   :  { %v1349_v38 = vmul.f32 %v1345_v50, %v2392_v40 }
 0xa34   :  { %v1352_v51 = vadd.f32 %v1349_v38, %v1334_v39 }
 0xa36   :  { %v1370_v52 = vadd.f32 %v1367_v43, %v1352_v51  ;;  %v1381_v53 = vpop.permute.xlu1 %1380 }
 0xa37   :  { %v1385_v46 = vmul.f32 %v1381_v53, %v2437_v24 }
 0xa39   :  { %v1388_v54 = vadd.f32 %v1385_v46, %v1370_v52 }
 0xa3b   :  { %1892 = vmatmul.mubr.msk.f32.gmra.mrb[24].mxu0 %vm283_vm7, %v1388_v54  ;;  %vm1484_vm7 = vcmp.eq.s32.totalorder %v2337_v18, %v2489_v14 }
 0xa3c   :  { %vm1491_vm1 = vmand %vm1484_vm7, %vm1490_vm2 }
 0xa3d   :  { %v1492_v17 = vsel %vm1491_vm1, 0.25, %v2033_v19 }
 0xaeb   :  { %v1464_v55 = vpop.f32.mrb[20].mxu0 }
 0xaec   :  { %v1887_v56 = vpop.f32.mrb[21].mxu0 }
 0xaff   :  { %v1469_v40 = vpop.f32.mrb[22].mxu0 }
 0xb00   :  { %v1954_v60 = vpack.c.bf16 %v1469_v40, %v1464_v55  ;;  %v1890_v24 = vpop.f32.mrb[23].mxu0 }
 0xb02   :  { %1955 = vmatpush3.bf16.msra.mxu1 %v1954_v60 }
 0xb03   :  { %1898 = vmatprep.subr.mxu1 %v2033_v19 }
 0xb0e   :  { %v1474_v63 = vpop.f32.mrb[24].mxu0 }
 0xb0f   :  { %v1893_v0 = vpop.f32.mrb[25].mxu0  ;;  %1899 = vmatpush3.msra.mxu1 %v1474_v63 }
 0xb10   :  { %1901 = vmatmul.mubr.msk.f32.vlgmr.msra.gmra.mrb[28].mxu1 %vm1194_vm11, %v1492_v17 }
 0xbe3   :  { %v1562_v3 = vpop.f32.mrb[28].mxu1 }
 0xbe4   :  { %v1567_v1 = vrot.slane %v1562_v3, 1  ;;  %v1571_v2 = vrot.slane %v1562_v3, 2  ;;  %v1902_v4 = vpop.f32.mrb[29].mxu1  ;;  %v1575_v23 = vrot.slane %v1562_v3, 3 }
 0xbe6   :  { %1568 = vrot.lane.b32.xlu1 %v1567_v1, %s2042_s25  ;;  %1572 = vrot.lane.b32.xlu0 %v1571_v2, %s2043_s26 }
 0xbea   :  { %1576 = vrot.lane.b32.xlu1 %v1575_v23, %s2044_s27 }
 0xc58   :  { %v1569_v18 = vpop.permute.xlu1 %1568  ;;  %v1573_v19 = vpop.permute.xlu0 %1572 }
 0xc59   :  { %v1579_v14 = vsel %vm467_vm10, %v1562_v3, %v1569_v18 }
 0xc5a   :  { %v1580_v5 = vsel %vm2574_vm3, %v1579_v14, %v1573_v19 }
 0xc5c   :  { %v1577_v6 = vpop.permute.xlu1 %1576 }
 0xc5d   :  { %v1582_v7 = vsel %vm1581_vm6, %v1580_v5, %v1577_v6 }
 0xc5e   :  { %1583 = vst [vmem:[#allocation3] sm:$0x1] %v1582_v7 }
 0xc5f   :  { %2019 = shalt.err (!%p2016_p4)
}
 0xc60   :  { %s2020_s12 = scalar_lea.hbm %s2562_s8, 16 }
 0xc61   :  { %p2021_p5 = scmp.ne.s32.totalorder %s2562_s8, %s2020_s12  ;;  %p2024_p6 = scmp.lt.u32.totalorder %s2020_s12, %s2562_s8 }
 0xc63   :  { %p2026_p7 = pnand %p2024_p6, %p2021_p5 }
 0xc65   :  { %2029 = shalt.err (!%p2026_p7)
}
 0xc66   :  { %1593 = dma.vmem_to_hbm [thread:$0]  %s1591_s29, 16, %s2562_s8, [#allocation4]  }
 0xc67   :  { %2030 = dma.done.wait [#allocation4], 16  }
 0xc68   :  { %2031 = vsyncadd [#allocation4], 4294967280 }
 0xc69   :  { %1597 = vsyncpa [#allocation4], 1 }

</bundles_post_ra>
